<compile_context>
chip_gen: v7x
topology: tpu7x:2x2x1
jax: 0.10.0
libtpu: 0.0.40
codegen_flags: <defaults>
</compile_context>

<pallas_src>
import jax
import jax.numpy as jnp
from jax.experimental import pallas as pl
from jax.experimental.pallas import tpu as pltpu

H1, H2, OUT = 50, 25, 10
OUT_PAD = 128  # lane-dense width used ONLY for the in-register softmax


def mlp_kernel(x_ref, w1_ref, b1_ref, w2_ref, b2_ref, w3_ref, b3_ref, o_ref):
    # Layer 1: Linear(num_features -> 50) + ReLU
    h1 = jnp.dot(x_ref[...], w1_ref[...], preferred_element_type=jnp.float32)
    h1 = jnp.maximum(h1 + b1_ref[...], 0.0)
    # Layer 2: Linear(50 -> 25) + ReLU
    h2 = jnp.dot(h1, w2_ref[...], preferred_element_type=jnp.float32)
    h2 = jnp.maximum(h2 + b2_ref[...], 0.0)
    # Layer 3: Linear(25 -> 10), lane-padded to 128 in-register; padded lanes
    # carry a -1e30 bias so they vanish under softmax.
    logits = jnp.dot(h2, w3_ref[...], preferred_element_type=jnp.float32)
    logits = logits + b3_ref[...]
    # Numerically stable softmax over the (lane-aligned) class axis.
    m = jnp.max(logits, axis=1, keepdims=True)
    e = jnp.exp(logits - m)
    denom = jnp.sum(e, axis=1, keepdims=True)
    p = e / denom  # exact f32; VPU/EUP have huge slack in this HBM-bound kernel
    # Store only the 10 real classes — narrow HBM writeback.
    o_ref[...] = p[:, :OUT].astype(o_ref.dtype)


def _lane(n):
    return -(-n // 128) * 128


def _sub(n):
    return -(-n // 8) * 8


def _pick_batch_tile(B, F, requested=None):
    """Batch-tile heuristic.

    - Small batches: one grid step (no per-step overhead on single-TC v5e/v6e).
    - Large batches: >= 4 steps so v7x's two TensorCores each pipeline >= 2.
    - Always clamp so double-buffered x tiles fit v7x's 64 MiB VMEM with room
      to spare (F-aware).
    """
    # Per-row VMEM cost: 2x-buffered x row (lane-padded) + output/intermediates.
    bytes_per_row = (2 * _lane(F) + 4 * OUT_PAD) * 4
    vmem_rows = max(8, ((40 << 20) // bytes_per_row) // 8 * 8)

    if requested is not None:
        tile = int(requested)
    elif B <= 1024:
        tile = B                              # single step: lowest latency path
    else:
        tile = max(8, (B // 4) // 8 * 8)      # >= 4 steps for v7x megacore pipelining

    tile = min(tile, B, vmem_rows)
    if tile < B:
        tile = max(8, (tile // 8) * 8)        # sub-full tiles must be sublane-aligned
    return tile


def _vmem_limit_bytes(batch_tile, F):
    """Per-step VMEM estimate: double-buffer only the streamed operands."""
    x_io = 2 * batch_tile * _lane(F) * 4            # streamed x, double-buffered
    out_io = 2 * batch_tile * _lane(OUT) * 4        # streamed narrow output, double-buffered
    inter = 3 * batch_tile * OUT_PAD * 4            # h1 / h2 / padded logits live values
    wts = (_sub(F) * _lane(H1) + _sub(H1) * _lane(H2) + _sub(H2) * OUT_PAD
           + 3 * 8 * 128) * 4                       # resident weights/biases, single buffer
    est = x_io + out_io + inter + wts
    # Above v5e's 16 MiB scoped default, below ~48 MiB to leave headroom under
    # v7x's 64 MiB physical VMEM (Mosaic internal scratch, etc.).
    return int(min(max(2 * est, 32 << 20), 48 << 20))


def mlp_classifier(x, params, *, batch_tile=None):
    """x: (B, F) float32. params: dict of w1,b1,w2,b2,w3,b3 (weights as (in,out))."""
    B, F = x.shape
    w1 = params["w1"].astype(jnp.float32)
    b1 = params["b1"].astype(jnp.float32)
    w2 = params["w2"].astype(jnp.float32)
    b2 = params["b2"].astype(jnp.float32)
    w3 = params["w3"].astype(jnp.float32)
    b3 = params["b3"].astype(jnp.float32)

    # Pad the last layer to 128 lanes for the in-register softmax only; padded
    # lanes get a -1e30 bias so exp() -> 0 and the 128-lane softmax equals the
    # softmax over the 10 real classes.  (Safe only because bias/softmax are f32.)
    w3p = jnp.zeros((H2, OUT_PAD), jnp.float32).at[:, :OUT].set(w3)
    b3p = jnp.full((1, OUT_PAD), -1e30, jnp.float32).at[:, :OUT].set(b3)

    tile = _pick_batch_tile(B, F, batch_tile)
    grid = (pl.cdiv(B, tile),)

    def resident(shape):
        # Weights/biases: full-array block, constant (0, 0) index_map so Mosaic
        # keeps them VMEM-resident across the batch grid (no per-step DMA).
        return pl.BlockSpec(shape, lambda i: (0, 0))

    out = pl.pallas_call(
        mlp_kernel,
        out_shape=jax.ShapeDtypeStruct((B, OUT), jnp.float32),
        grid_spec=pl.GridSpec(
            grid=grid,
            in_specs=[
                pl.BlockSpec((tile, F), lambda i: (i, 0)),   # streamed x tile
                resident((F, H1)), resident((1, H1)),
                resident((H1, H2)), resident((1, H2)),
                resident((H2, OUT_PAD)), resident((1, OUT_PAD)),
            ],
            out_specs=pl.BlockSpec((tile, OUT), lambda i: (i, 0)),  # narrow output
        ),
        compiler_params=pltpu.CompilerParams(
            dimension_semantics=("parallel",),   # shards batch steps over v7x's 2 TCs
            vmem_limit_bytes=_vmem_limit_bytes(tile, F),
        ),
    )(x, w1, b1, w2, b2, w3p, b3p)

    return out


def init_params(key, num_features):
    """Deterministic init mimicking nn.Linear's U(-1/sqrt(fan_in), 1/sqrt(fan_in))."""
    dims = [(num_features, H1), (H1, H2), (H2, OUT)]
    params = {}
    keys = jax.random.split(key, 2 * len(dims))
    for n, (fan_in, fan_out) in enumerate(dims):
        bound = 1.0 / jnp.sqrt(jnp.float32(fan_in))
        w = jax.random.uniform(keys[2 * n], (fan_in, fan_out),
                               minval=-bound, maxval=bound, dtype=jnp.float32)
        b = jax.random.uniform(keys[2 * n + 1], (1, fan_out),
                               minval=-bound, maxval=bound, dtype=jnp.float32)
        params[f"w{n + 1}"] = w
        params[f"b{n + 1}"] = b
    return params


def reference_forward(x, params):
    h = jnp.maximum(x @ params["w1"] + params["b1"], 0.0)
    h = jnp.maximum(h @ params["w2"] + params["b2"], 0.0)
    logits = h @ params["w3"] + params["b3"]
    return jax.nn.softmax(logits, axis=1)


if __name__ == "__main__":
    key = jax.random.PRNGKey(0)
    k_x, k_p = jax.random.split(key)

    batch, num_features = 512, 64
    x = jax.random.normal(k_x, (batch, num_features), dtype=jnp.float32)
    params = init_params(k_p, num_features)

    # Default path: small batch -> single grid step (1-TC latency-optimal).
    out_single = jax.block_until_ready(mlp_classifier(x, params))
    # Explicit tiling path: 4 grid steps, exercises BlockSpec pipelining and
    # the "parallel" batch axis (2 steps per TC on v7x).
    out_tiled = jax.block_until_ready(mlp_classifier(x, params, batch_tile=128))

    ref = reference_forward(x, params)
    for out in (out_single, out_tiled):
        assert out.shape == (batch, OUT)
        assert jnp.allclose(jnp.sum(out, axis=1), 1.0, atol=1e-5)
        assert jnp.allclose(out, ref, atol=1e-5, rtol=1e-5)

    print("KERNEL_OK")
</pallas_src>

<mosaic_0001>
module attributes {stable_mosaic.version = 11 : i64} {
  func.func @mlp_kernel(%arg0: i32, %arg1: memref<512x64xf32, #tpu.memory_space<vmem>>, %arg2: memref<64x50xf32, #tpu.memory_space<vmem>>, %arg3: memref<1x50xf32, #tpu.memory_space<vmem>>, %arg4: memref<50x25xf32, #tpu.memory_space<vmem>>, %arg5: memref<1x25xf32, #tpu.memory_space<vmem>>, %arg6: memref<25x128xf32, #tpu.memory_space<vmem>>, %arg7: memref<1x128xf32, #tpu.memory_space<vmem>>, %arg8: memref<512x10xf32, #tpu.memory_space<vmem>>) attributes {dimension_semantics = [#tpu.dimension_semantics<parallel>], iteration_bounds = array<i64: 1>, scalar_prefetch = 0 : i64, scratch_operands = 0 : i64, tpu.core_type = #tpu.core_type<tc>, window_params = [{transform_indices = @transform_0, window_bounds = array<i64: 512, 64>}, {pipeline_mode = #tpu.pipeline_mode<synchronous>, transform_indices = @transform_1, window_bounds = array<i64: 64, 50>}, {pipeline_mode = #tpu.pipeline_mode<synchronous>, transform_indices = @transform_2, window_bounds = array<i64: 1, 50>}, {pipeline_mode = #tpu.pipeline_mode<synchronous>, transform_indices = @transform_3, window_bounds = array<i64: 50, 25>}, {pipeline_mode = #tpu.pipeline_mode<synchronous>, transform_indices = @transform_4, window_bounds = array<i64: 1, 25>}, {pipeline_mode = #tpu.pipeline_mode<synchronous>, transform_indices = @transform_5, window_bounds = array<i64: 25, 128>}, {pipeline_mode = #tpu.pipeline_mode<synchronous>, transform_indices = @transform_6, window_bounds = array<i64: 1, 128>}, {transform_indices = @transform_7, window_bounds = array<i64: 512, 10>}]} {
    %c0 = arith.constant 0 : index
    %c0_0 = arith.constant 0 : index
    %0 = vector.load %arg1[%c0, %c0_0] : memref<512x64xf32, #tpu.memory_space<vmem>>, vector<512x64xf32>
    %c0_1 = arith.constant 0 : index
    %c0_2 = arith.constant 0 : index
    %1 = vector.load %arg2[%c0_1, %c0_2] : memref<64x50xf32, #tpu.memory_space<vmem>>, vector<64x50xf32>
    %cst = arith.constant dense<0.000000e+00> : vector<512x50xf32>
    %2 = tpu.matmul %0, %1, %cst {dimension_numbers = #tpu.dot_dimension_numbers<[1], [0], [0], [1], [0, 0, 1, 1], [], []>} : vector<512x64xf32>, vector<64x50xf32>, vector<512x50xf32> -> vector<512x50xf32>
    %c0_3 = arith.constant 0 : index
    %c0_4 = arith.constant 0 : index
    %3 = vector.load %arg3[%c0_3, %c0_4] : memref<1x50xf32, #tpu.memory_space<vmem>>, vector<1x50xf32>
    %4 = vector.broadcast %3 : vector<1x50xf32> to vector<512x50xf32>
    %5 = arith.addf %2, %4 : vector<512x50xf32>
    %cst_5 = arith.constant 0.000000e+00 : f32
    %6 = vector.broadcast %cst_5 : f32 to vector<512x50xf32>
    %7 = arith.maximumf %5, %6 : vector<512x50xf32>
    %c0_6 = arith.constant 0 : index
    %c0_7 = arith.constant 0 : index
    %8 = vector.load %arg4[%c0_6, %c0_7] : memref<50x25xf32, #tpu.memory_space<vmem>>, vector<50x25xf32>
    %cst_8 = arith.constant dense<0.000000e+00> : vector<512x25xf32>
    %9 = tpu.matmul %7, %8, %cst_8 {dimension_numbers = #tpu.dot_dimension_numbers<[1], [0], [0], [1], [0, 0, 1, 1], [], []>} : vector<512x50xf32>, vector<50x25xf32>, vector<512x25xf32> -> vector<512x25xf32>
    %c0_9 = arith.constant 0 : index
    %c0_10 = arith.constant 0 : index
    %10 = vector.load %arg5[%c0_9, %c0_10] : memref<1x25xf32, #tpu.memory_space<vmem>>, vector<1x25xf32>
    %11 = vector.broadcast %10 : vector<1x25xf32> to vector<512x25xf32>
    %12 = arith.addf %9, %11 : vector<512x25xf32>
    %cst_11 = arith.constant 0.000000e+00 : f32
    %13 = vector.broadcast %cst_11 : f32 to vector<512x25xf32>
    %14 = arith.maximumf %12, %13 : vector<512x25xf32>
    %c0_12 = arith.constant 0 : index
    %c0_13 = arith.constant 0 : index
    %15 = vector.load %arg6[%c0_12, %c0_13] : memref<25x128xf32, #tpu.memory_space<vmem>>, vector<25x128xf32>
    %cst_14 = arith.constant dense<0.000000e+00> : vector<512x128xf32>
    %16 = tpu.matmul %14, %15, %cst_14 {dimension_numbers = #tpu.dot_dimension_numbers<[1], [0], [0], [1], [0, 0, 1, 1], [], []>} : vector<512x25xf32>, vector<25x128xf32>, vector<512x128xf32> -> vector<512x128xf32>
    %c0_15 = arith.constant 0 : index
    %c0_16 = arith.constant 0 : index
    %17 = vector.load %arg7[%c0_15, %c0_16] : memref<1x128xf32, #tpu.memory_space<vmem>>, vector<1x128xf32>
    %18 = vector.broadcast %17 : vector<1x128xf32> to vector<512x128xf32>
    %19 = arith.addf %16, %18 : vector<512x128xf32>
    %cst_17 = arith.constant dense<0xFF800000> : vector<512xf32>
    %20 = vector.multi_reduction <maximumf>, %19, %cst_17 [1] : vector<512x128xf32> to vector<512xf32>
    %21 = vector.shape_cast %20 : vector<512xf32> to vector<512x1xf32>
    %22 = vector.broadcast %21 : vector<512x1xf32> to vector<512x128xf32>
    %23 = arith.subf %19, %22 : vector<512x128xf32>
    %24 = math.exp %23 : vector<512x128xf32>
    %cst_18 = arith.constant dense<0.000000e+00> : vector<512xf32>
    %25 = vector.multi_reduction <add>, %24, %cst_18 [1] : vector<512x128xf32> to vector<512xf32>
    %26 = vector.shape_cast %25 : vector<512xf32> to vector<512x1xf32>
    %27 = vector.broadcast %26 : vector<512x1xf32> to vector<512x128xf32>
    %28 = arith.divf %24, %27 : vector<512x128xf32>
    %29 = vector.extract_strided_slice %28 {offsets = [0, 0], sizes = [512, 10], strides = [1, 1]} : vector<512x128xf32> to vector<512x10xf32>
    %c0_19 = arith.constant 0 : index
    %c0_20 = arith.constant 0 : index
    %30 = vector.load %arg8[%c0_19, %c0_20] : memref<512x10xf32, #tpu.memory_space<vmem>>, vector<512x10xf32>
    tpu.vector_store %arg8[%c0_19, %c0_20], %29 {strides = array<i32>} : memref<512x10xf32, #tpu.memory_space<vmem>>, vector<512x10xf32>,
    return
  }
  func.func @transform_0(%arg0: i32) -> (i32, i32) {
    %c0_i32 = arith.constant 0 : i32
    %c0_i32_0 = arith.constant 0 : i32
    return %arg0, %c0_i32 : i32, i32
  }
  func.func @transform_1(%arg0: i32) -> (i32, i32) {
    %c0_i32 = arith.constant 0 : i32
    %c0_i32_0 = arith.constant 0 : i32
    %c0_i32_1 = arith.constant 0 : i32
    return %c0_i32, %c0_i32_0 : i32, i32
  }
  func.func @transform_2(%arg0: i32) -> (i32, i32) {
    %c0_i32 = arith.constant 0 : i32
    %c0_i32_0 = arith.constant 0 : i32
    %c0_i32_1 = arith.constant 0 : i32
    return %c0_i32, %c0_i32_0 : i32, i32
  }
  func.func @transform_3(%arg0: i32) -> (i32, i32) {
    %c0_i32 = arith.constant 0 : i32
    %c0_i32_0 = arith.constant 0 : i32
    %c0_i32_1 = arith.constant 0 : i32
    return %c0_i32, %c0_i32_0 : i32, i32
  }
  func.func @transform_4(%arg0: i32) -> (i32, i32) {
    %c0_i32 = arith.constant 0 : i32
    %c0_i32_0 = arith.constant 0 : i32
    %c0_i32_1 = arith.constant 0 : i32
    return %c0_i32, %c0_i32_0 : i32, i32
  }
  func.func @transform_5(%arg0: i32) -> (i32, i32) {
    %c0_i32 = arith.constant 0 : i32
    %c0_i32_0 = arith.constant 0 : i32
    %c0_i32_1 = arith.constant 0 : i32
    return %c0_i32, %c0_i32_0 : i32, i32
  }
  func.func @transform_6(%arg0: i32) -> (i32, i32) {
    %c0_i32 = arith.constant 0 : i32
    %c0_i32_0 = arith.constant 0 : i32
    %c0_i32_1 = arith.constant 0 : i32
    return %c0_i32, %c0_i32_0 : i32, i32
  }
  func.func @transform_7(%arg0: i32) -> (i32, i32) {
    %c0_i32 = arith.constant 0 : i32
    %c0_i32_0 = arith.constant 0 : i32
    return %arg0, %c0_i32 : i32, i32
  }
}

</mosaic_0001>

<bundles_post_ra>
// kernel: tpu_custom_call.1
= control target key start
LH: loop header
LB: loop body
LE: loop exit
PB: predicated region body
PF: predicated region fallthrough
CT: control target
= control target key end

     0   :  { %vm105_vm0 = vcmask 523264   ;;  %vm954_vm1 = vcmask 1041408   ;;  %vm761_vm2 = vcmask 408576   ;;  %vm1611_vm3 = vcmask 1040384   ;;  %s5147_s1 = inlined_call_operand.vmem [shape: f32[64,50], index: 1, kind: input, shape index: {}]   ;;  %s5148_s0 = inlined_call_operand.vmem [shape: f32[512,64], index: 0, kind: input, shape index: {}]   ;;  %s5149_s3 = inlined_call_operand.vmem [shape: f32[50,25], index: 3, kind: input, shape index: {}]   ;;  %s5150_s2 = inlined_call_operand.vmem [shape: f32[1,50], index: 2, kind: input, shape index: {}]   ;;  %s5151_s5 = inlined_call_operand.vmem [shape: f32[25,128], index: 5, kind: input, shape index: {}]   ;;  %s5152_s4 = inlined_call_operand.vmem [shape: f32[1,25], index: 4, kind: input, shape index: {}]   ;;  %s5153_s6 = inlined_call_operand.vmem [shape: f32[1,128], index: 6, kind: input, shape index: {}]   ;;  %s5154_s7 = inlined_call_operand.vmem [shape: f32[512,10], index: 7, kind: output, shape index: {}]  }
   0x1   :  { %v90_v0 = vld [vmem:[%s5147_s1] sm:$0xff]  ;;  %v91_v1 = vld [vmem:[%s5147_s1 + $0x8] sm:$0xff]  ;;  %v92_v2 = vld [vmem:[%s5147_s1 + $0x10] sm:$0xff]  ;;  %vm3682_vm4 = vmmov 1   ;;  %vm1418_vm6 = vcmask 203776   ;;  %vm2576_vm7 = vcmask 80896  }
   0x2   :  { %v3379_v3 = vpack.c.bf16 %v91_v1, %v90_v0  ;;  %v93_v4 = vld [vmem:[%s5147_s1 + $0x18] sm:$0xff]  ;;  %v94_v6 = vld [vmem:[%s5147_s1 + $0x20] sm:$0xff]  ;;  %v95_v7 = vld [vmem:[%s5147_s1 + $0x28] sm:$0xff] }
   0x3   :  { %v3383_v5 = vpack.c.bf16 %v93_v4, %v92_v2  ;;  %v26_v8 = vld [vmem:[%s5148_s0] sm:$0xff]  ;;  %v3387_v9 = vpack.c.bf16 %v95_v7, %v94_v6  ;;  %v96_v10 = vld [vmem:[%s5147_s1 + $0x30] sm:$0xff]  ;;  %v97_v11 = vld [vmem:[%s5147_s1 + $0x38] sm:$0xff] }
   0x4   :  { %3380 = vmatprep.subr.bf16.mxu0 %v3379_v3  ;;  %3069 = vmatprep.mubr.msk.f32.mxu0 %vm105_vm0, %v26_v8  ;;  %v3391_v12 = vpack.c.bf16 %v97_v11, %v96_v10  ;;  %v27_v13 = vld [vmem:[%s5148_s0 + $0x8] sm:$0xff]  ;;  %v28_v14 = vld [vmem:[%s5148_s0 + $0x10] sm:$0xff]  ;;  %v747_v15 = vld [vmem:[%s5149_s3] sm:$0xff] }
   0x5   :  { %3382 = vmatpush3.bf16.msra.mxu0 %v3379_v3  ;;  %v748_v16 = vld [vmem:[%s5149_s3 + $0x8] sm:$0xff]  ;;  %v29_v18 = vld [vmem:[%s5148_s0 + $0x18] sm:$0xff]  ;;  %v30_v19 = vld [vmem:[%s5148_s0 + $0x20] sm:$0xff] }
   0x6   :  { %3384 = vmatprep.subr.bf16.mxu0 %v3383_v5  ;;  %v3395_v17 = vpack.c.bf16 %v748_v16, %v747_v15  ;;  %v31_v20 = vld [vmem:[%s5148_s0 + $0x28] sm:$0xff]  ;;  %v749_v21 = vld [vmem:[%s5149_s3 + $0x10] sm:$0xff]  ;;  %v750_v22 = vld [vmem:[%s5149_s3 + $0x18] sm:$0xff] }
   0x7   :  { %v32_v23 = vld [vmem:[%s5148_s0 + $0x30] sm:$0xff]  ;;  %v3399_v24 = vpack.c.bf16 %v750_v22, %v749_v21  ;;  %v751_v25 = vld [vmem:[%s5149_s3 + $0x20] sm:$0xff]  ;;  %v752_v26 = vld [vmem:[%s5149_s3 + $0x28] sm:$0xff] }
   0x8   :  { %3417 = vmatprep.subr.bf16.mxu1 %v3395_v17  ;;  %v3403_v27 = vpack.c.bf16 %v752_v26, %v751_v25  ;;  %v33_v28 = vld [vmem:[%s5148_s0 + $0x38] sm:$0xff]  ;;  %v34_v29 = vld [vmem:[%s5148_s0 + $0x40] sm:$0xff]  ;;  %v753_v30 = vld [vmem:[%s5149_s3 + $0x30] sm:$0x3] }
   0x9   :  { %3386 = vmatpush3.bf16.msra.mxu0 %v3383_v5  ;;  %3421 = vmatpush3.bf16.msra.mxu1 %v3395_v17  ;;  %v35_v31 = vld [vmem:[%s5148_s0 + $0x48] sm:$0xff]  ;;  %v36_v32 = vld [vmem:[%s5148_s0 + $0x50] sm:$0xff]  ;;  %v37_v33 = vld [vmem:[%s5148_s0 + $0x58] sm:$0xff] }
   0xa   :  { %3388 = vmatprep.subr.bf16.mxu0 %v3387_v9  ;;  %3418 = vmatprep.subr.bf16.mxu1 %v3399_v24  ;;  %v38_v34 = vld [vmem:[%s5148_s0 + $0x60] sm:$0xff]  ;;  %v39_v35 = vld [vmem:[%s5148_s0 + $0x68] sm:$0xff]  ;;  %v40_v36 = vld [vmem:[%s5148_s0 + $0x70] sm:$0xff] }
   0xb   :  { %v41_v37 = vld [vmem:[%s5148_s0 + $0x78] sm:$0xff]  ;;  %v42_v38 = vld [vmem:[%s5148_s0 + $0x80] sm:$0xff]  ;;  %v43_v39 = vld [vmem:[%s5148_s0 + $0x88] sm:$0xff] }
   0xc   :  { %v44_v40 = vld [vmem:[%s5148_s0 + $0x90] sm:$0xff]  ;;  %v45_v41 = vld [vmem:[%s5148_s0 + $0x98] sm:$0xff]  ;;  %v46_v42 = vld [vmem:[%s5148_s0 + $0xa0] sm:$0xff] }
   0xd   :  { %3390 = vmatpush3.bf16.msra.mxu0 %v3387_v9  ;;  %3422 = vmatpush3.bf16.msra.mxu1 %v3399_v24  ;;  %v47_v43 = vld [vmem:[%s5148_s0 + $0xa8] sm:$0xff]  ;;  %v48_v44 = vld [vmem:[%s5148_s0 + $0xb0] sm:$0xff]  ;;  %v49_v45 = vld [vmem:[%s5148_s0 + $0xb8] sm:$0xff] }
   0xe   :  { %3392 = vmatprep.subr.bf16.mxu0 %v3391_v12  ;;  %3419 = vmatprep.subr.bf16.mxu1 %v3403_v27  ;;  %v50_v46 = vld [vmem:[%s5148_s0 + $0xc0] sm:$0xff]  ;;  %v51_v47 = vld [vmem:[%s5148_s0 + $0xc8] sm:$0xff]  ;;  %v52_v48 = vld [vmem:[%s5148_s0 + $0xd0] sm:$0xff] }
   0xf   :  { %v53_v49 = vld [vmem:[%s5148_s0 + $0xd8] sm:$0xff]  ;;  %v54_v50 = vld [vmem:[%s5148_s0 + $0xe0] sm:$0xff]  ;;  %v55_v51 = vld [vmem:[%s5148_s0 + $0xe8] sm:$0xff] }
  0x10   :  { %v56_v52 = vld [vmem:[%s5148_s0 + $0xf0] sm:$0xff]  ;;  %v57_v53 = vld [vmem:[%s5148_s0 + $0xf8] sm:$0xff]  ;;  %v58_v54 = vld [vmem:[%s5148_s0 + $0x100] sm:$0xff] }
  0x11   :  { %3394 = vmatpush3.bf16.msra.mxu0 %v3391_v12  ;;  %3423 = vmatpush3.bf16.msra.mxu1 %v3403_v27  ;;  %v59_v55 = vld [vmem:[%s5148_s0 + $0x108] sm:$0xff]  ;;  %v60_v56 = vld [vmem:[%s5148_s0 + $0x110] sm:$0xff]  ;;  %v61_v57 = vld [vmem:[%s5148_s0 + $0x118] sm:$0xff] }
  0x12   :  { %3396 = vmatprep.subr.bf16.mxu0 %v3395_v17  ;;  %3420 = vmatprep.subr.msk.mxu1 %vm954_vm1, %v753_v30  ;;  %v62_v58 = vld [vmem:[%s5148_s0 + $0x120] sm:$0xff]  ;;  %v63_v59 = vld [vmem:[%s5148_s0 + $0x128] sm:$0xff]  ;;  %v64_v60 = vld [vmem:[%s5148_s0 + $0x130] sm:$0xff] }
  0x13   :  { %v65_v61 = vld [vmem:[%s5148_s0 + $0x138] sm:$0xff]  ;;  %v66_v62 = vld [vmem:[%s5148_s0 + $0x140] sm:$0xff]  ;;  %v67_v63 = vld [vmem:[%s5148_s0 + $0x148] sm:$0xff] }
  0x14   :  { %3070 = vmatmul.mubr.msk.f32.vlgmr.msra.gmra.mrb[0].mxu0 %vm105_vm0, %v27_v13  ;;  %v68_v0 = vld [vmem:[%s5148_s0 + $0x150] sm:$0xff]  ;;  %v69_v1 = vld [vmem:[%s5148_s0 + $0x158] sm:$0xff]  ;;  %v70_v2 = vld [vmem:[%s5148_s0 + $0x160] sm:$0xff] }
  0x15   :  { %3072 = vmatprep.mubr.msk.f32.mxu0 %vm105_vm0, %v28_v14  ;;  %3398 = vmatpush3.bf16.msra.mxu0 %v3395_v17  ;;  %v71_v3 = vld [vmem:[%s5148_s0 + $0x168] sm:$0xff]  ;;  %v72_v4 = vld [vmem:[%s5148_s0 + $0x170] sm:$0xff]  ;;  %v73_v5 = vld [vmem:[%s5148_s0 + $0x178] sm:$0xff] }
  0x16   :  { %3400 = vmatprep.subr.bf16.mxu0 %v3399_v24  ;;  %3424 = vmatpush3.msk.msra.mxu1 %vm954_vm1, %v753_v30  ;;  %v74_v6 = vld [vmem:[%s5148_s0 + $0x180] sm:$0xff]  ;;  %v75_v7 = vld [vmem:[%s5148_s0 + $0x188] sm:$0xff]  ;;  %v76_v8 = vld [vmem:[%s5148_s0 + $0x190] sm:$0xff] }
  0x17   :  { %v77_v9 = vld [vmem:[%s5148_s0 + $0x198] sm:$0xff]  ;;  %v78_v10 = vld [vmem:[%s5148_s0 + $0x1a0] sm:$0xff]  ;;  %v79_v11 = vld [vmem:[%s5148_s0 + $0x1a8] sm:$0xff] }
  0x18   :  { %3073 = vmatmul.mubr.msk.f32.gmra.mrb[2].mxu0 %vm105_vm0, %v29_v18  ;;  %v80_v12 = vld [vmem:[%s5148_s0 + $0x1b0] sm:$0xff]  ;;  %v81_v13 = vld [vmem:[%s5148_s0 + $0x1b8] sm:$0xff]  ;;  %v82_v14 = vld [vmem:[%s5148_s0 + $0x1c0] sm:$0xff] }
  0x19   :  { %3075 = vmatprep.mubr.msk.f32.mxu0 %vm105_vm0, %v30_v19  ;;  %3402 = vmatpush3.bf16.msra.mxu0 %v3399_v24  ;;  %v83_v15 = vld [vmem:[%s5148_s0 + $0x1c8] sm:$0xff]  ;;  %v84_v16 = vld [vmem:[%s5148_s0 + $0x1d0] sm:$0xff]  ;;  %v85_v17 = vld [vmem:[%s5148_s0 + $0x1d8] sm:$0xff] }
  0x1a   :  { %3404 = vmatprep.subr.bf16.mxu0 %v3403_v27  ;;  %v86_v18 = vld [vmem:[%s5148_s0 + $0x1e0] sm:$0xff]  ;;  %v87_v19 = vld [vmem:[%s5148_s0 + $0x1e8] sm:$0xff]  ;;  %v89_v21 = vld [vmem:[%s5148_s0 + $0x1f8] sm:$0xff] }
  0x1b   :  { %v4031_v22 = vld [vmem:[%s5150_s2] ss:$0 sm:$0xff]  ;;  %vm3412_vm5 = vmpackc.low %vm1611_vm3, %vm3682_vm4 }
  0x1c   :  { %3076 = vmatmul.mubr.msk.f32.gmra.mrb[4].mxu0 %vm105_vm0, %v31_v20  ;;  %v88_v20 = vld [vmem:[%s5148_s0 + $0x1f0] sm:$0xff] }
  0x1d   :  { %3078 = vmatprep.mubr.msk.f32.mxu0 %vm105_vm0, %v32_v23  ;;  %3406 = vmatpush3.bf16.msra.mxu0 %v3403_v27 }
  0x1e   :  { %3177 = vmatprep.subr.msk.mxu0 %vm954_vm1, %v753_v30 }
  0x20   :  { %3079 = vmatmul.mubr.msk.f32.gmra.mrb[6].mxu0 %vm105_vm0, %v33_v28 }
  0x21   :  { %3081 = vmatprep.mubr.msk.f32.mxu0 %vm105_vm0, %v34_v29  ;;  %3178 = vmatpush3.msk.msra.mxu0 %vm954_vm1, %v753_v30  ;;  %v1407_v29 = vld [vmem:[%s5151_s5] sm:$0xff]  ;;  %v1408_v30 = vld [vmem:[%s5151_s5 + $0x8] sm:$0xff] }
  0x24   :  { %3082 = vmatmul.mubr.msk.f32.gmra.mrb[8].mxu0 %vm105_vm0, %v35_v31 }
  0x25   :  { %3084 = vmatprep.mubr.msk.f32.mxu0 %vm105_vm0, %v36_v32 }
  0x28   :  { %3085 = vmatmul.mubr.msk.f32.gmra.mrb[10].mxu0 %vm105_vm0, %v37_v33 }
  0x29   :  { %3087 = vmatprep.mubr.msk.f32.mxu0 %vm105_vm0, %v38_v34  ;;  %v4042_v34 = vpack.c.bf16 %v1408_v30, %v1407_v29 }
  0x2b   :  { %3408 = vmatprep.subr.bf16.mxu1 %v4042_v34 }
  0x2c   :  { %3088 = vmatmul.mubr.msk.f32.gmra.mrb[12].mxu0 %vm105_vm0, %v39_v35 }
  0x2d   :  { %3090 = vmatprep.mubr.msk.f32.mxu0 %vm105_vm0, %v40_v36 }
  0x30   :  { %3091 = vmatmul.mubr.msk.f32.gmra.mrb[14].mxu0 %vm105_vm0, %v41_v37 }
  0x31   :  { %3093 = vmatprep.mubr.msk.f32.mxu0 %vm105_vm0, %v42_v38 }
  0x34   :  { %3094 = vmatmul.mubr.msk.f32.gmra.mrb[16].mxu0 %vm105_vm0, %v43_v39 }
  0x35   :  { %3096 = vmatprep.mubr.msk.f32.mxu0 %vm105_vm0, %v44_v40 }
  0x38   :  { %3097 = vmatmul.mubr.msk.f32.gmra.mrb[18].mxu0 %vm105_vm0, %v45_v41 }
  0x39   :  { %3099 = vmatprep.mubr.msk.f32.mxu0 %vm105_vm0, %v46_v42 }
  0x3c   :  { %3100 = vmatmul.mubr.msk.f32.gmra.mrb[20].mxu0 %vm105_vm0, %v47_v43 }
  0x3d   :  { %3102 = vmatprep.mubr.msk.f32.mxu0 %vm105_vm0, %v48_v44 }
  0x40   :  { %3103 = vmatmul.mubr.msk.f32.gmra.mrb[22].mxu0 %vm105_vm0, %v49_v45 }
  0x41   :  { %3105 = vmatprep.mubr.msk.f32.mxu0 %vm105_vm0, %v50_v46 }
  0x44   :  { %3106 = vmatmul.mubr.msk.f32.gmra.mrb[24].mxu0 %vm105_vm0, %v51_v47 }
  0x45   :  { %3108 = vmatprep.mubr.msk.f32.mxu0 %vm105_vm0, %v52_v48 }
  0x48   :  { %3109 = vmatmul.mubr.msk.f32.gmra.mrb[26].mxu0 %vm105_vm0, %v53_v49 }
  0x49   :  { %3111 = vmatprep.mubr.msk.f32.mxu0 %vm105_vm0, %v54_v50 }
  0x4c   :  { %3112 = vmatmul.mubr.msk.f32.gmra.mrb[28].mxu0 %vm105_vm0, %v55_v51 }
  0x4d   :  { %3114 = vmatprep.mubr.msk.f32.mxu0 %vm105_vm0, %v56_v52 }
  0x50   :  { %3115 = vmatmul.mubr.msk.f32.gmra.mrb[30].mxu0 %vm105_vm0, %v57_v53 }
  0x51   :  { %3117 = vmatprep.mubr.msk.f32.mxu0 %vm105_vm0, %v58_v54 }
  0x54   :  { %3118 = vmatmul.mubr.msk.f32.gmra.mrb[32].mxu0 %vm105_vm0, %v59_v55 }
  0x55   :  { %3120 = vmatprep.mubr.msk.f32.mxu0 %vm105_vm0, %v60_v56 }
  0x58   :  { %3121 = vmatmul.mubr.msk.f32.gmra.mrb[34].mxu0 %vm105_vm0, %v61_v57 }
  0x59   :  { %3123 = vmatprep.mubr.msk.f32.mxu0 %vm105_vm0, %v62_v58 }
  0x5c   :  { %3124 = vmatmul.mubr.msk.f32.gmra.mrb[36].mxu0 %vm105_vm0, %v63_v59 }
  0x5d   :  { %3126 = vmatprep.mubr.msk.f32.mxu0 %vm105_vm0, %v64_v60 }
  0x60   :  { %3127 = vmatmul.mubr.msk.f32.gmra.mrb[38].mxu0 %vm105_vm0, %v65_v61 }
  0x61   :  { %3129 = vmatprep.mubr.msk.f32.mxu0 %vm105_vm0, %v66_v62 }
  0x64   :  { %3130 = vmatmul.mubr.msk.f32.gmra.mrb[40].mxu0 %vm105_vm0, %v67_v63 }
  0x65   :  { %3132 = vmatprep.mubr.msk.f32.mxu0 %vm105_vm0, %v68_v0 }
  0x68   :  { %3133 = vmatmul.mubr.msk.f32.gmra.mrb[42].mxu0 %vm105_vm0, %v69_v1 }
  0x69   :  { %3135 = vmatprep.mubr.msk.f32.mxu0 %vm105_vm0, %v70_v2 }
  0x6c   :  { %3136 = vmatmul.mubr.msk.f32.gmra.mrb[44].mxu0 %vm105_vm0, %v71_v3 }
  0x6d   :  { %3138 = vmatprep.mubr.msk.f32.mxu0 %vm105_vm0, %v72_v4 }
  0x70   :  { %3139 = vmatmul.mubr.msk.f32.gmra.mrb[46].mxu0 %vm105_vm0, %v73_v5 }
  0x71   :  { %3141 = vmatprep.mubr.msk.f32.mxu0 %vm105_vm0, %v74_v6 }
  0x74   :  { %3142 = vmatmul.mubr.msk.f32.gmra.mrb[48].mxu0 %vm105_vm0, %v75_v7 }
  0x75   :  { %3144 = vmatprep.mubr.msk.f32.mxu0 %vm105_vm0, %v76_v8 }
  0x78   :  { %3145 = vmatmul.mubr.msk.f32.gmra.mrb[50].mxu0 %vm105_vm0, %v77_v9 }
  0x79   :  { %3147 = vmatprep.mubr.msk.f32.mxu0 %vm105_vm0, %v78_v10 }
  0x7c   :  { %3148 = vmatmul.mubr.msk.f32.gmra.mrb[52].mxu0 %vm105_vm0, %v79_v11 }
  0x7d   :  { %3150 = vmatprep.mubr.msk.f32.mxu0 %vm105_vm0, %v80_v12 }
  0x80   :  { %3151 = vmatmul.mubr.msk.f32.gmra.mrb[54].mxu0 %vm105_vm0, %v81_v13 }
  0x81   :  { %3153 = vmatprep.mubr.msk.f32.mxu0 %vm105_vm0, %v82_v14 }
  0x84   :  { %3154 = vmatmul.mubr.msk.f32.gmra.mrb[56].mxu0 %vm105_vm0, %v83_v15 }
  0x85   :  { %3156 = vmatprep.mubr.msk.f32.mxu0 %vm105_vm0, %v84_v16 }
  0x88   :  { %3157 = vmatmul.mubr.msk.f32.gmra.mrb[58].mxu0 %vm105_vm0, %v85_v17 }
  0x89   :  { %3159 = vmatprep.mubr.msk.f32.mxu0 %vm105_vm0, %v86_v18 }
  0x8c   :  { %3160 = vmatmul.mubr.msk.f32.gmra.mrb[60].mxu0 %vm105_vm0, %v87_v19 }
  0x8d   :  { %3162 = vmatprep.mubr.msk.f32.mxu0 %vm105_vm0, %v88_v20 }
  0x90   :  { %3163 = vmatmul.mubr.msk.f32.gmra.mrb[62].mxu0 %vm105_vm0, %v89_v21 }
  0xe7   :  { %v3071_v23 = vpop.f32.mrb[0].mxu0 }
  0xe8   :  { %v370_v24 = vadd.f32 %v3071_v23, %v4031_v22  ;;  %v364_v25 = vpop.f32.mrb[1].mxu0 }
  0xe9   :  { %v365_v26 = vadd.f32 %v4031_v22, %v364_v25 }
  0xea   :  { %v684_v31 = vmax.f32 %v370_v24, 0.0 }
  0xeb   :  { %v683_v27 = vmax.f32 %v365_v26, 0.0  ;;  %v3074_v28 = vpop.f32.mrb[2].mxu0 }
  0xec   :  { %v380_v32 = vadd.f32 %v3074_v28, %v4031_v22  ;;  %v374_v33 = vpop.f32.mrb[3].mxu0 }
  0xed   :  { %v375_v35 = vadd.f32 %v4031_v22, %v374_v33  ;;  %3179 = vmatprep.mubr.msk.f32.mxu0 %vm761_vm2, %v683_v27 }
  0xee   :  { %3180 = vmatmul.mubr.msk.f32.vlgmr.msra.gmra.mrb[64].mxu0 %vm761_vm2, %v684_v31  ;;  %v686_v38 = vmax.f32 %v380_v32, 0.0 }
  0xef   :  { %v685_v36 = vmax.f32 %v375_v35, 0.0  ;;  %v3077_v37 = vpop.f32.mrb[4].mxu0 }
  0xf0   :  { %v390_v39 = vadd.f32 %v3077_v37, %v4031_v22  ;;  %v384_v40 = vpop.f32.mrb[5].mxu0 }
  0xf1   :  { %v385_v41 = vadd.f32 %v4031_v22, %v384_v40  ;;  %3182 = vmatprep.mubr.msk.f32.mxu0 %vm761_vm2, %v685_v36 }
  0xf2   :  { %v688_v42 = vmax.f32 %v390_v39, 0.0  ;;  %3183 = vmatmul.mubr.msk.f32.gmra.mrb[66].mxu0 %vm761_vm2, %v686_v38 }
  0xf3   :  { %v687_v43 = vmax.f32 %v385_v41, 0.0  ;;  %v3080_v44 = vpop.f32.mrb[6].mxu0 }
  0xf4   :  { %v400_v45 = vadd.f32 %v3080_v44, %v4031_v22  ;;  %v394_v46 = vpop.f32.mrb[7].mxu0 }
  0xf5   :  { %v395_v47 = vadd.f32 %v4031_v22, %v394_v46  ;;  %3185 = vmatprep.mubr.msk.f32.mxu0 %vm761_vm2, %v687_v43 }
  0xf6   :  { %v690_v48 = vmax.f32 %v400_v45, 0.0  ;;  %3186 = vmatmul.mubr.msk.f32.gmra.mrb[68].mxu0 %vm761_vm2, %v688_v42 }
  0xf7   :  { %v689_v49 = vmax.f32 %v395_v47, 0.0  ;;  %v3083_v50 = vpop.f32.mrb[8].mxu0 }
  0xf8   :  { %v410_v51 = vadd.f32 %v3083_v50, %v4031_v22  ;;  %v404_v52 = vpop.f32.mrb[9].mxu0 }
  0xf9   :  { %v405_v53 = vadd.f32 %v4031_v22, %v404_v52  ;;  %3188 = vmatprep.mubr.msk.f32.mxu0 %vm761_vm2, %v689_v49 }
  0xfa   :  { %v692_v54 = vmax.f32 %v410_v51, 0.0  ;;  %3189 = vmatmul.mubr.msk.f32.gmra.mrb[70].mxu0 %vm761_vm2, %v690_v48 }
  0xfb   :  { %v691_v55 = vmax.f32 %v405_v53, 0.0  ;;  %v3086_v56 = vpop.f32.mrb[10].mxu0 }
  0xfc   :  { %v420_v57 = vadd.f32 %v3086_v56, %v4031_v22  ;;  %v414_v58 = vpop.f32.mrb[11].mxu0 }
  0xfd   :  { %v415_v59 = vadd.f32 %v4031_v22, %v414_v58  ;;  %3191 = vmatprep.mubr.msk.f32.mxu0 %vm761_vm2, %v691_v55  ;;  %v1409_v58 = vld [vmem:[%s5151_s5 + $0x10] sm:$0xff] }
  0xfe   :  { %v694_v60 = vmax.f32 %v420_v57, 0.0  ;;  %3192 = vmatmul.mubr.msk.f32.gmra.mrb[72].mxu0 %vm761_vm2, %v692_v54 }
  0xff   :  { %v693_v61 = vmax.f32 %v415_v59, 0.0  ;;  %v3089_v62 = vpop.f32.mrb[12].mxu0  ;;  %v1410_v59 = vld [vmem:[%s5151_s5 + $0x18] sm:$0x1] }
 0x100   :  { %v430_v63 = vadd.f32 %v3089_v62, %v4031_v22  ;;  %v424_v0 = vpop.f32.mrb[13].mxu0 }
 0x101   :  { %v425_v1 = vadd.f32 %v4031_v22, %v424_v0  ;;  %3194 = vmatprep.mubr.msk.f32.mxu0 %vm761_vm2, %v693_v61 }
 0x102   :  { %v696_v2 = vmax.f32 %v430_v63, 0.0  ;;  %3195 = vmatmul.mubr.msk.f32.gmra.mrb[74].mxu0 %vm761_vm2, %v694_v60 }
 0x103   :  { %v695_v3 = vmax.f32 %v425_v1, 0.0  ;;  %v3092_v4 = vpop.f32.mrb[14].mxu0  ;;  %v3411_v1 = vpack.c.bf16 %v1410_v59, %v1409_v58 }
 0x104   :  { %v440_v5 = vadd.f32 %v3092_v4, %v4031_v22  ;;  %v434_v6 = vpop.f32.mrb[15].mxu0 }
 0x105   :  { %v435_v7 = vadd.f32 %v4031_v22, %v434_v6  ;;  %3197 = vmatprep.mubr.msk.f32.mxu0 %vm761_vm2, %v695_v3 }
 0x106   :  { %v698_v8 = vmax.f32 %v440_v5, 0.0  ;;  %3198 = vmatmul.mubr.msk.f32.gmra.mrb[76].mxu0 %vm761_vm2, %v696_v2 }
 0x107   :  { %v697_v9 = vmax.f32 %v435_v7, 0.0  ;;  %v3095_v10 = vpop.f32.mrb[16].mxu0 }
 0x108   :  { %v450_v11 = vadd.f32 %v3095_v10, %v4031_v22  ;;  %v444_v12 = vpop.f32.mrb[17].mxu0 }
 0x109   :  { %v445_v13 = vadd.f32 %v4031_v22, %v444_v12  ;;  %3200 = vmatprep.mubr.msk.f32.mxu0 %vm761_vm2, %v697_v9 }
 0x10a   :  { %v700_v14 = vmax.f32 %v450_v11, 0.0  ;;  %3201 = vmatmul.mubr.msk.f32.gmra.mrb[78].mxu0 %vm761_vm2, %v698_v8 }
 0x10b   :  { %v699_v15 = vmax.f32 %v445_v13, 0.0  ;;  %v3098_v16 = vpop.f32.mrb[18].mxu0 }
 0x10c   :  { %v460_v17 = vadd.f32 %v3098_v16, %v4031_v22  ;;  %v454_v18 = vpop.f32.mrb[19].mxu0 }
 0x10d   :  { %v455_v19 = vadd.f32 %v4031_v22, %v454_v18  ;;  %3203 = vmatprep.mubr.msk.f32.mxu0 %vm761_vm2, %v699_v15 }
 0x10e   :  { %v702_v20 = vmax.f32 %v460_v17, 0.0  ;;  %3204 = vmatmul.mubr.msk.f32.gmra.mrb[80].mxu0 %vm761_vm2, %v700_v14 }
 0x10f   :  { %v701_v21 = vmax.f32 %v455_v19, 0.0  ;;  %v3101_v23 = vpop.f32.mrb[20].mxu0 }
 0x110   :  { %v470_v24 = vadd.f32 %v3101_v23, %v4031_v22  ;;  %v464_v25 = vpop.f32.mrb[21].mxu0 }
 0x111   :  { %v465_v26 = vadd.f32 %v4031_v22, %v464_v25  ;;  %3206 = vmatprep.mubr.msk.f32.mxu0 %vm761_vm2, %v701_v21 }
 0x112   :  { %v704_v27 = vmax.f32 %v470_v24, 0.0  ;;  %3207 = vmatmul.mubr.msk.f32.gmra.mrb[82].mxu0 %vm761_vm2, %v702_v20 }
 0x113   :  { %v703_v28 = vmax.f32 %v465_v26, 0.0  ;;  %v3104_v29 = vpop.f32.mrb[22].mxu0 }
 0x114   :  { %v480_v30 = vadd.f32 %v3104_v29, %v4031_v22  ;;  %v474_v31 = vpop.f32.mrb[23].mxu0 }
 0x115   :  { %v475_v32 = vadd.f32 %v4031_v22, %v474_v31  ;;  %3209 = vmatprep.mubr.msk.f32.mxu0 %vm761_vm2, %v703_v28 }
 0x116   :  { %v706_v33 = vmax.f32 %v480_v30, 0.0  ;;  %3210 = vmatmul.mubr.msk.f32.gmra.mrb[84].mxu0 %vm761_vm2, %v704_v27 }
 0x117   :  { %v705_v35 = vmax.f32 %v475_v32, 0.0  ;;  %v3107_v36 = vpop.f32.mrb[24].mxu0 }
 0x118   :  { %v490_v37 = vadd.f32 %v3107_v36, %v4031_v22  ;;  %v484_v38 = vpop.f32.mrb[25].mxu0 }
 0x119   :  { %v485_v39 = vadd.f32 %v4031_v22, %v484_v38  ;;  %3212 = vmatprep.mubr.msk.f32.mxu0 %vm761_vm2, %v705_v35 }
 0x11a   :  { %v708_v40 = vmax.f32 %v490_v37, 0.0  ;;  %3213 = vmatmul.mubr.msk.f32.gmra.mrb[86].mxu0 %vm761_vm2, %v706_v33 }
 0x11b   :  { %v707_v41 = vmax.f32 %v485_v39, 0.0  ;;  %v3110_v42 = vpop.f32.mrb[26].mxu0 }
 0x11c   :  { %v500_v43 = vadd.f32 %v3110_v42, %v4031_v22  ;;  %v494_v44 = vpop.f32.mrb[27].mxu0 }
 0x11d   :  { %v495_v45 = vadd.f32 %v4031_v22, %v494_v44  ;;  %3215 = vmatprep.mubr.msk.f32.mxu0 %vm761_vm2, %v707_v41 }
 0x11e   :  { %v710_v46 = vmax.f32 %v500_v43, 0.0  ;;  %3216 = vmatmul.mubr.msk.f32.gmra.mrb[88].mxu0 %vm761_vm2, %v708_v40 }
 0x11f   :  { %v709_v47 = vmax.f32 %v495_v45, 0.0  ;;  %v3113_v48 = vpop.f32.mrb[28].mxu0 }
 0x120   :  { %v510_v49 = vadd.f32 %v3113_v48, %v4031_v22  ;;  %v504_v50 = vpop.f32.mrb[29].mxu0 }
 0x121   :  { %v505_v51 = vadd.f32 %v4031_v22, %v504_v50  ;;  %3218 = vmatprep.mubr.msk.f32.mxu0 %vm761_vm2, %v709_v47 }
 0x122   :  { %v712_v52 = vmax.f32 %v510_v49, 0.0  ;;  %3219 = vmatmul.mubr.msk.f32.gmra.mrb[90].mxu0 %vm761_vm2, %v710_v46 }
 0x123   :  { %v711_v53 = vmax.f32 %v505_v51, 0.0  ;;  %v3116_v54 = vpop.f32.mrb[30].mxu0 }
 0x124   :  { %v520_v55 = vadd.f32 %v3116_v54, %v4031_v22  ;;  %v514_v56 = vpop.f32.mrb[31].mxu0 }
 0x125   :  { %v515_v57 = vadd.f32 %v4031_v22, %v514_v56  ;;  %3221 = vmatprep.mubr.msk.f32.mxu0 %vm761_vm2, %v711_v53 }
 0x126   :  { %v714_v60 = vmax.f32 %v520_v55, 0.0  ;;  %3222 = vmatmul.mubr.msk.f32.gmra.mrb[92].mxu0 %vm761_vm2, %v712_v52 }
 0x127   :  { %v713_v61 = vmax.f32 %v515_v57, 0.0  ;;  %v3119_v62 = vpop.f32.mrb[32].mxu0 }
 0x128   :  { %v530_v63 = vadd.f32 %v3119_v62, %v4031_v22  ;;  %v524_v0 = vpop.f32.mrb[33].mxu0 }
 0x129   :  { %v525_v2 = vadd.f32 %v4031_v22, %v524_v0  ;;  %3224 = vmatprep.mubr.msk.f32.mxu1 %vm761_vm2, %v713_v61 }
 0x12a   :  { %v716_v3 = vmax.f32 %v530_v63, 0.0  ;;  %3225 = vmatmul.mubr.msk.f32.vlgmr.msra.gmra.mrb[0].mxu1 %vm761_vm2, %v714_v60 }
 0x12b   :  { %v715_v4 = vmax.f32 %v525_v2, 0.0  ;;  %v3122_v5 = vpop.f32.mrb[34].mxu0  ;;  %3410 = vmatpush3.bf16.msra.mxu1 %v4042_v34 }
 0x12c   :  { %v540_v6 = vadd.f32 %v3122_v5, %v4031_v22  ;;  %v534_v7 = vpop.f32.mrb[35].mxu0  ;;  %3413 = vmatprep.subr.msk.bf16.mxu1 %vm3412_vm5, %v3411_v1 }
 0x12d   :  { %v535_v8 = vadd.f32 %v4031_v22, %v534_v7  ;;  %3227 = vmatprep.mubr.msk.f32.mxu1 %vm761_vm2, %v715_v4 }
 0x12e   :  { %v718_v9 = vmax.f32 %v540_v6, 0.0  ;;  %3228 = vmatmul.mubr.msk.f32.gmra.mrb[2].mxu1 %vm761_vm2, %v716_v3 }
 0x12f   :  { %v717_v10 = vmax.f32 %v535_v8, 0.0  ;;  %v3125_v11 = vpop.f32.mrb[36].mxu0  ;;  %3416 = vmatpush3.bf16.msk.msra.mxu1 %vm3412_vm5, %v3411_v1 }
 0x130   :  { %v550_v12 = vadd.f32 %v3125_v11, %v4031_v22  ;;  %v544_v13 = vpop.f32.mrb[37].mxu0 }
 0x131   :  { %v545_v14 = vadd.f32 %v4031_v22, %v544_v13  ;;  %3230 = vmatprep.mubr.msk.f32.mxu1 %vm761_vm2, %v717_v10 }
 0x132   :  { %v720_v34 = vmax.f32 %v550_v12, 0.0  ;;  %3231 = vmatmul.mubr.msk.f32.gmra.mrb[4].mxu1 %vm761_vm2, %v718_v9 }
 0x133   :  { %v719_v15 = vmax.f32 %v545_v14, 0.0  ;;  %v3128_v16 = vpop.f32.mrb[38].mxu0 }
 0x134   :  { %v560_v17 = vadd.f32 %v3128_v16, %v4031_v22  ;;  %v554_v18 = vpop.f32.mrb[39].mxu0 }
 0x135   :  { %v555_v19 = vadd.f32 %v4031_v22, %v554_v18  ;;  %3233 = vmatprep.mubr.msk.f32.mxu1 %vm761_vm2, %v719_v15 }
 0x136   :  { %v722_v20 = vmax.f32 %v560_v17, 0.0  ;;  %3234 = vmatmul.mubr.msk.f32.gmra.mrb[6].mxu1 %vm761_vm2, %v720_v34 }
 0x137   :  { %v721_v21 = vmax.f32 %v555_v19, 0.0  ;;  %v3131_v23 = vpop.f32.mrb[40].mxu0 }
 0x138   :  { %v570_v24 = vadd.f32 %v3131_v23, %v4031_v22  ;;  %v564_v25 = vpop.f32.mrb[41].mxu0 }
 0x139   :  { %v565_v26 = vadd.f32 %v4031_v22, %v564_v25  ;;  %3236 = vmatprep.mubr.msk.f32.mxu1 %vm761_vm2, %v721_v21 }
 0x13a   :  { %v724_v27 = vmax.f32 %v570_v24, 0.0  ;;  %3237 = vmatmul.mubr.msk.f32.gmra.mrb[8].mxu1 %vm761_vm2, %v722_v20 }
 0x13b   :  { %v723_v28 = vmax.f32 %v565_v26, 0.0  ;;  %v3134_v29 = vpop.f32.mrb[42].mxu0 }
 0x13c   :  { %v580_v30 = vadd.f32 %v3134_v29, %v4031_v22  ;;  %v574_v31 = vpop.f32.mrb[43].mxu0 }
 0x13d   :  { %v575_v32 = vadd.f32 %v4031_v22, %v574_v31  ;;  %3239 = vmatprep.mubr.msk.f32.mxu1 %vm761_vm2, %v723_v28 }
 0x13e   :  { %v726_v33 = vmax.f32 %v580_v30, 0.0  ;;  %3240 = vmatmul.mubr.msk.f32.gmra.mrb[10].mxu1 %vm761_vm2, %v724_v27 }
 0x13f   :  { %v725_v35 = vmax.f32 %v575_v32, 0.0  ;;  %v3137_v36 = vpop.f32.mrb[44].mxu0  ;;  %v4180_v32 = vld [vmem:[%s5152_s4] ss:$0 sm:$0xff] }
 0x140   :  { %v590_v37 = vadd.f32 %v3137_v36, %v4031_v22  ;;  %v584_v38 = vpop.f32.mrb[45].mxu0 }
 0x141   :  { %v585_v39 = vadd.f32 %v4031_v22, %v584_v38  ;;  %3242 = vmatprep.mubr.msk.f32.mxu1 %vm761_vm2, %v725_v35 }
 0x142   :  { %v728_v40 = vmax.f32 %v590_v37, 0.0  ;;  %3243 = vmatmul.mubr.msk.f32.gmra.mrb[12].mxu1 %vm761_vm2, %v726_v33 }
 0x143   :  { %v727_v41 = vmax.f32 %v585_v39, 0.0  ;;  %v3140_v42 = vpop.f32.mrb[46].mxu0 }
 0x144   :  { %v600_v43 = vadd.f32 %v3140_v42, %v4031_v22  ;;  %v594_v44 = vpop.f32.mrb[47].mxu0 }
 0x145   :  { %v595_v45 = vadd.f32 %v4031_v22, %v594_v44  ;;  %3245 = vmatprep.mubr.msk.f32.mxu1 %vm761_vm2, %v727_v41 }
 0x146   :  { %v730_v46 = vmax.f32 %v600_v43, 0.0  ;;  %3246 = vmatmul.mubr.msk.f32.gmra.mrb[14].mxu1 %vm761_vm2, %v728_v40 }
 0x147   :  { %v729_v47 = vmax.f32 %v595_v45, 0.0  ;;  %v3143_v48 = vpop.f32.mrb[48].mxu0 }
 0x148   :  { %v610_v49 = vadd.f32 %v3143_v48, %v4031_v22  ;;  %v604_v50 = vpop.f32.mrb[49].mxu0 }
 0x149   :  { %v605_v51 = vadd.f32 %v4031_v22, %v604_v50  ;;  %3248 = vmatprep.mubr.msk.f32.mxu1 %vm761_vm2, %v729_v47 }
 0x14a   :  { %v732_v52 = vmax.f32 %v610_v49, 0.0  ;;  %3249 = vmatmul.mubr.msk.f32.gmra.mrb[16].mxu1 %vm761_vm2, %v730_v46 }
 0x14b   :  { %v731_v53 = vmax.f32 %v605_v51, 0.0  ;;  %v3146_v54 = vpop.f32.mrb[50].mxu0 }
 0x14c   :  { %v620_v55 = vadd.f32 %v3146_v54, %v4031_v22  ;;  %v614_v56 = vpop.f32.mrb[51].mxu0 }
 0x14d   :  { %v615_v57 = vadd.f32 %v4031_v22, %v614_v56  ;;  %3251 = vmatprep.mubr.msk.f32.mxu1 %vm761_vm2, %v731_v53 }
 0x14e   :  { %v734_v58 = vmax.f32 %v620_v55, 0.0  ;;  %3252 = vmatmul.mubr.msk.f32.gmra.mrb[18].mxu1 %vm761_vm2, %v732_v52 }
 0x14f   :  { %v733_v59 = vmax.f32 %v615_v57, 0.0  ;;  %v3149_v60 = vpop.f32.mrb[52].mxu0 }
 0x150   :  { %v630_v61 = vadd.f32 %v3149_v60, %v4031_v22  ;;  %v624_v62 = vpop.f32.mrb[53].mxu0 }
 0x151   :  { %v625_v63 = vadd.f32 %v4031_v22, %v624_v62  ;;  %3254 = vmatprep.mubr.msk.f32.mxu1 %vm761_vm2, %v733_v59 }
 0x152   :  { %v736_v0 = vmax.f32 %v630_v61, 0.0  ;;  %3255 = vmatmul.mubr.msk.f32.gmra.mrb[20].mxu1 %vm761_vm2, %v734_v58 }
 0x153   :  { %v735_v1 = vmax.f32 %v625_v63, 0.0  ;;  %v3152_v2 = vpop.f32.mrb[54].mxu0 }
 0x154   :  { %v640_v3 = vadd.f32 %v3152_v2, %v4031_v22  ;;  %v634_v4 = vpop.f32.mrb[55].mxu0 }
 0x155   :  { %v635_v5 = vadd.f32 %v4031_v22, %v634_v4  ;;  %3257 = vmatprep.mubr.msk.f32.mxu1 %vm761_vm2, %v735_v1 }
 0x156   :  { %v738_v6 = vmax.f32 %v640_v3, 0.0  ;;  %3258 = vmatmul.mubr.msk.f32.gmra.mrb[22].mxu1 %vm761_vm2, %v736_v0 }
 0x157   :  { %v737_v7 = vmax.f32 %v635_v5, 0.0  ;;  %v3155_v8 = vpop.f32.mrb[56].mxu0 }
 0x158   :  { %v650_v9 = vadd.f32 %v3155_v8, %v4031_v22  ;;  %v644_v10 = vpop.f32.mrb[57].mxu0 }
 0x159   :  { %v645_v11 = vadd.f32 %v4031_v22, %v644_v10  ;;  %3260 = vmatprep.mubr.msk.f32.mxu1 %vm761_vm2, %v737_v7 }
 0x15a   :  { %v740_v12 = vmax.f32 %v650_v9, 0.0  ;;  %3261 = vmatmul.mubr.msk.f32.gmra.mrb[24].mxu1 %vm761_vm2, %v738_v6 }
 0x15b   :  { %v739_v13 = vmax.f32 %v645_v11, 0.0  ;;  %v3158_v14 = vpop.f32.mrb[58].mxu0 }
 0x15c   :  { %v660_v34 = vadd.f32 %v3158_v14, %v4031_v22  ;;  %v654_v15 = vpop.f32.mrb[59].mxu0 }
 0x15d   :  { %v655_v16 = vadd.f32 %v4031_v22, %v654_v15  ;;  %3263 = vmatprep.mubr.msk.f32.mxu1 %vm761_vm2, %v739_v13 }
 0x15e   :  { %v742_v17 = vmax.f32 %v660_v34, 0.0  ;;  %3264 = vmatmul.mubr.msk.f32.gmra.mrb[26].mxu1 %vm761_vm2, %v740_v12 }
 0x15f   :  { %v741_v18 = vmax.f32 %v655_v16, 0.0  ;;  %v3161_v19 = vpop.f32.mrb[60].mxu0 }
 0x160   :  { %v670_v20 = vadd.f32 %v3161_v19, %v4031_v22  ;;  %v664_v21 = vpop.f32.mrb[61].mxu0 }
 0x161   :  { %v665_v23 = vadd.f32 %v4031_v22, %v664_v21  ;;  %3266 = vmatprep.mubr.msk.f32.mxu1 %vm761_vm2, %v741_v18 }
 0x162   :  { %v744_v24 = vmax.f32 %v670_v20, 0.0  ;;  %3267 = vmatmul.mubr.msk.f32.gmra.mrb[28].mxu1 %vm761_vm2, %v742_v17 }
 0x163   :  { %v743_v25 = vmax.f32 %v665_v23, 0.0  ;;  %v3164_v26 = vpop.f32.mrb[62].mxu0 }
 0x164   :  { %v680_v27 = vadd.f32 %v3164_v26, %v4031_v22  ;;  %v674_v28 = vpop.f32.mrb[63].mxu0 }
 0x165   :  { %v675_v29 = vadd.f32 %v4031_v22, %v674_v28  ;;  %3269 = vmatprep.mubr.msk.f32.mxu1 %vm761_vm2, %v743_v25 }
 0x166   :  { %v746_v30 = vmax.f32 %v680_v27, 0.0  ;;  %3270 = vmatmul.mubr.msk.f32.gmra.mrb[30].mxu1 %vm761_vm2, %v744_v24 }
 0x167   :  { %v745_v31 = vmax.f32 %v675_v29, 0.0 }
 0x169   :  { %3272 = vmatprep.mubr.msk.f32.mxu1 %vm761_vm2, %v745_v31 }
 0x16a   :  { %3273 = vmatmul.mubr.msk.f32.gmra.mrb[32].mxu1 %vm761_vm2, %v746_v30 }
 0x1c1   :  { %v3181_v33 = vpop.f32.mrb[64].mxu0 }
 0x1c2   :  { %v1030_v35 = vadd.f32 %v3181_v33, %v4180_v32  ;;  %v1024_v36 = vpop.f32.mrb[65].mxu0 }
 0x1c3   :  { %v1025_v22 = vadd.f32 %v4180_v32, %v1024_v36 }
 0x1c4   :  { %v1344_v39 = vmax.f32 %v1030_v35, 0.0 }
 0x1c5   :  { %v1343_v37 = vmax.f32 %v1025_v22, 0.0  ;;  %v3184_v38 = vpop.f32.mrb[66].mxu0 }
 0x1c6   :  { %v1040_v40 = vadd.f32 %v3184_v38, %v4180_v32  ;;  %v1034_v41 = vpop.f32.mrb[67].mxu0 }
 0x1c7   :  { %v1035_v42 = vadd.f32 %v4180_v32, %v1034_v41  ;;  %3283 = vmatprep.mubr.msk.f32.mxu1 %vm1418_vm6, %v1343_v37 }
 0x1c8   :  { %3284 = vmatmul.mubr.msk.f32.vlgmr.msra.gmra.mrb[34].mxu1 %vm1418_vm6, %v1344_v39  ;;  %v1346_v45 = vmax.f32 %v1040_v40, 0.0 }
 0x1c9   :  { %v1345_v43 = vmax.f32 %v1035_v42, 0.0  ;;  %v3187_v44 = vpop.f32.mrb[68].mxu0 }
 0x1ca   :  { %v1050_v46 = vadd.f32 %v3187_v44, %v4180_v32  ;;  %v1044_v47 = vpop.f32.mrb[69].mxu0 }
 0x1cb   :  { %v1045_v48 = vadd.f32 %v4180_v32, %v1044_v47  ;;  %3286 = vmatprep.mubr.msk.f32.mxu1 %vm1418_vm6, %v1345_v43 }
 0x1cc   :  { %v1348_v49 = vmax.f32 %v1050_v46, 0.0  ;;  %3287 = vmatmul.mubr.msk.f32.gmra.mrb[36].mxu1 %vm1418_vm6, %v1346_v45 }
 0x1cd   :  { %v1347_v50 = vmax.f32 %v1045_v48, 0.0  ;;  %v3190_v51 = vpop.f32.mrb[70].mxu0 }
 0x1ce   :  { %v1060_v52 = vadd.f32 %v3190_v51, %v4180_v32  ;;  %v1054_v53 = vpop.f32.mrb[71].mxu0 }
 0x1cf   :  { %v1055_v54 = vadd.f32 %v4180_v32, %v1054_v53  ;;  %3289 = vmatprep.mubr.msk.f32.mxu1 %vm1418_vm6, %v1347_v50 }
 0x1d0   :  { %v1350_v55 = vmax.f32 %v1060_v52, 0.0  ;;  %3290 = vmatmul.mubr.msk.f32.gmra.mrb[38].mxu1 %vm1418_vm6, %v1348_v49 }
 0x1d1   :  { %v1349_v56 = vmax.f32 %v1055_v54, 0.0  ;;  %v3193_v57 = vpop.f32.mrb[72].mxu0 }
 0x1d2   :  { %v1070_v58 = vadd.f32 %v3193_v57, %v4180_v32  ;;  %v1064_v59 = vpop.f32.mrb[73].mxu0 }
 0x1d3   :  { %v1065_v60 = vadd.f32 %v4180_v32, %v1064_v59  ;;  %3292 = vmatprep.mubr.msk.f32.mxu1 %vm1418_vm6, %v1349_v56 }
 0x1d4   :  { %v1352_v61 = vmax.f32 %v1070_v58, 0.0  ;;  %3293 = vmatmul.mubr.msk.f32.gmra.mrb[40].mxu1 %vm1418_vm6, %v1350_v55 }
 0x1d5   :  { %v1351_v62 = vmax.f32 %v1065_v60, 0.0  ;;  %v3196_v63 = vpop.f32.mrb[74].mxu0 }
 0x1d6   :  { %v1080_v0 = vadd.f32 %v3196_v63, %v4180_v32  ;;  %v1074_v1 = vpop.f32.mrb[75].mxu0 }
 0x1d7   :  { %v1075_v2 = vadd.f32 %v4180_v32, %v1074_v1  ;;  %3295 = vmatprep.mubr.msk.f32.mxu1 %vm1418_vm6, %v1351_v62 }
 0x1d8   :  { %v1354_v3 = vmax.f32 %v1080_v0, 0.0  ;;  %3296 = vmatmul.mubr.msk.f32.gmra.mrb[42].mxu1 %vm1418_vm6, %v1352_v61 }
 0x1d9   :  { %v1353_v4 = vmax.f32 %v1075_v2, 0.0  ;;  %v3199_v5 = vpop.f32.mrb[76].mxu0 }
 0x1da   :  { %v1090_v6 = vadd.f32 %v3199_v5, %v4180_v32  ;;  %v1084_v7 = vpop.f32.mrb[77].mxu0 }
 0x1db   :  { %v1085_v8 = vadd.f32 %v4180_v32, %v1084_v7  ;;  %3298 = vmatprep.mubr.msk.f32.mxu1 %vm1418_vm6, %v1353_v4 }
 0x1dc   :  { %v1356_v9 = vmax.f32 %v1090_v6, 0.0  ;;  %3299 = vmatmul.mubr.msk.f32.gmra.mrb[44].mxu1 %vm1418_vm6, %v1354_v3 }
 0x1dd   :  { %v1355_v10 = vmax.f32 %v1085_v8, 0.0  ;;  %v3202_v11 = vpop.f32.mrb[78].mxu0 }
 0x1de   :  { %v1100_v12 = vadd.f32 %v3202_v11, %v4180_v32  ;;  %v1094_v13 = vpop.f32.mrb[79].mxu0 }
 0x1df   :  { %v1095_v14 = vadd.f32 %v4180_v32, %v1094_v13  ;;  %3301 = vmatprep.mubr.msk.f32.mxu1 %vm1418_vm6, %v1355_v10 }
 0x1e0   :  { %v1358_v34 = vmax.f32 %v1100_v12, 0.0  ;;  %3302 = vmatmul.mubr.msk.f32.gmra.mrb[46].mxu1 %vm1418_vm6, %v1356_v9 }
 0x1e1   :  { %v1357_v15 = vmax.f32 %v1095_v14, 0.0  ;;  %v3205_v16 = vpop.f32.mrb[80].mxu0 }
 0x1e2   :  { %v1110_v17 = vadd.f32 %v3205_v16, %v4180_v32  ;;  %v1104_v18 = vpop.f32.mrb[81].mxu0 }
 0x1e3   :  { %v1105_v19 = vadd.f32 %v4180_v32, %v1104_v18  ;;  %3304 = vmatprep.mubr.msk.f32.mxu1 %vm1418_vm6, %v1357_v15 }
 0x1e4   :  { %v1360_v20 = vmax.f32 %v1110_v17, 0.0  ;;  %3305 = vmatmul.mubr.msk.f32.gmra.mrb[48].mxu1 %vm1418_vm6, %v1358_v34 }
 0x1e5   :  { %v1359_v21 = vmax.f32 %v1105_v19, 0.0  ;;  %v3208_v23 = vpop.f32.mrb[82].mxu0 }
 0x1e6   :  { %v1120_v24 = vadd.f32 %v3208_v23, %v4180_v32  ;;  %v1114_v25 = vpop.f32.mrb[83].mxu0 }
 0x1e7   :  { %v1115_v26 = vadd.f32 %v4180_v32, %v1114_v25  ;;  %3307 = vmatprep.mubr.msk.f32.mxu1 %vm1418_vm6, %v1359_v21 }
 0x1e8   :  { %v1362_v27 = vmax.f32 %v1120_v24, 0.0  ;;  %3308 = vmatmul.mubr.msk.f32.gmra.mrb[50].mxu1 %vm1418_vm6, %v1360_v20 }
 0x1e9   :  { %v1361_v28 = vmax.f32 %v1115_v26, 0.0  ;;  %v3211_v29 = vpop.f32.mrb[84].mxu0 }
 0x1ea   :  { %v1130_v30 = vadd.f32 %v3211_v29, %v4180_v32  ;;  %v1124_v31 = vpop.f32.mrb[85].mxu0 }
 0x1eb   :  { %v1125_v33 = vadd.f32 %v4180_v32, %v1124_v31  ;;  %3310 = vmatprep.mubr.msk.f32.mxu1 %vm1418_vm6, %v1361_v28 }
 0x1ec   :  { %v1364_v35 = vmax.f32 %v1130_v30, 0.0  ;;  %3311 = vmatmul.mubr.msk.f32.gmra.mrb[52].mxu1 %vm1418_vm6, %v1362_v27 }
 0x1ed   :  { %v1363_v36 = vmax.f32 %v1125_v33, 0.0  ;;  %v3214_v22 = vpop.f32.mrb[86].mxu0 }
 0x1ee   :  { %v1140_v37 = vadd.f32 %v3214_v22, %v4180_v32  ;;  %v1134_v38 = vpop.f32.mrb[87].mxu0 }
 0x1ef   :  { %v1135_v39 = vadd.f32 %v4180_v32, %v1134_v38  ;;  %3313 = vmatprep.mubr.msk.f32.mxu1 %vm1418_vm6, %v1363_v36 }
 0x1f0   :  { %v1366_v40 = vmax.f32 %v1140_v37, 0.0  ;;  %3314 = vmatmul.mubr.msk.f32.gmra.mrb[54].mxu1 %vm1418_vm6, %v1364_v35 }
 0x1f1   :  { %v1365_v41 = vmax.f32 %v1135_v39, 0.0  ;;  %v3217_v42 = vpop.f32.mrb[88].mxu0 }
 0x1f2   :  { %v1150_v43 = vadd.f32 %v3217_v42, %v4180_v32  ;;  %v1144_v44 = vpop.f32.mrb[89].mxu0 }
 0x1f3   :  { %v1145_v45 = vadd.f32 %v4180_v32, %v1144_v44  ;;  %3316 = vmatprep.mubr.msk.f32.mxu1 %vm1418_vm6, %v1365_v41 }
 0x1f4   :  { %v1368_v46 = vmax.f32 %v1150_v43, 0.0  ;;  %3317 = vmatmul.mubr.msk.f32.gmra.mrb[56].mxu1 %vm1418_vm6, %v1366_v40 }
 0x1f5   :  { %v1367_v47 = vmax.f32 %v1145_v45, 0.0  ;;  %v3220_v48 = vpop.f32.mrb[90].mxu0 }
 0x1f6   :  { %v1160_v49 = vadd.f32 %v3220_v48, %v4180_v32  ;;  %v1154_v50 = vpop.f32.mrb[91].mxu0 }
 0x1f7   :  { %v1155_v51 = vadd.f32 %v4180_v32, %v1154_v50  ;;  %3319 = vmatprep.mubr.msk.f32.mxu1 %vm1418_vm6, %v1367_v47 }
 0x1f8   :  { %v1370_v52 = vmax.f32 %v1160_v49, 0.0  ;;  %3320 = vmatmul.mubr.msk.f32.gmra.mrb[58].mxu1 %vm1418_vm6, %v1368_v46 }
 0x1f9   :  { %v1369_v53 = vmax.f32 %v1155_v51, 0.0  ;;  %v3223_v54 = vpop.f32.mrb[92].mxu0 }
 0x1fa   :  { %v1170_v55 = vadd.f32 %v3223_v54, %v4180_v32  ;;  %v1164_v56 = vpop.f32.mrb[93].mxu0 }
 0x1fb   :  { %v1165_v57 = vadd.f32 %v4180_v32, %v1164_v56  ;;  %3322 = vmatprep.mubr.msk.f32.mxu1 %vm1418_vm6, %v1369_v53 }
 0x1fc   :  { %v1372_v58 = vmax.f32 %v1170_v55, 0.0  ;;  %3323 = vmatmul.mubr.msk.f32.gmra.mrb[60].mxu1 %vm1418_vm6, %v1370_v52 }
 0x1fd   :  { %v1371_v59 = vmax.f32 %v1165_v57, 0.0  ;;  %v3226_v60 = vpop.f32.mrb[0].mxu1 }
 0x1fe   :  { %v1180_v61 = vadd.f32 %v3226_v60, %v4180_v32  ;;  %v1174_v62 = vpop.f32.mrb[1].mxu1 }
 0x1ff   :  { %v1175_v63 = vadd.f32 %v4180_v32, %v1174_v62  ;;  %3325 = vmatprep.mubr.msk.f32.mxu1 %vm1418_vm6, %v1371_v59 }
 0x200   :  { %v1374_v0 = vmax.f32 %v1180_v61, 0.0  ;;  %3326 = vmatmul.mubr.msk.f32.gmra.mrb[62].mxu1 %vm1418_vm6, %v1372_v58 }
 0x201   :  { %v1373_v1 = vmax.f32 %v1175_v63, 0.0  ;;  %v3229_v2 = vpop.f32.mrb[2].mxu1 }
 0x202   :  { %v1190_v3 = vadd.f32 %v3229_v2, %v4180_v32  ;;  %v1184_v4 = vpop.f32.mrb[3].mxu1 }
 0x203   :  { %v1185_v5 = vadd.f32 %v4180_v32, %v1184_v4  ;;  %3328 = vmatprep.mubr.msk.f32.mxu1 %vm1418_vm6, %v1373_v1 }
 0x204   :  { %v1376_v6 = vmax.f32 %v1190_v3, 0.0  ;;  %3329 = vmatmul.mubr.msk.f32.gmra.mrb[64].mxu1 %vm1418_vm6, %v1374_v0 }
 0x205   :  { %v1375_v7 = vmax.f32 %v1185_v5, 0.0  ;;  %v3232_v8 = vpop.f32.mrb[4].mxu1 }
 0x206   :  { %v1200_v9 = vadd.f32 %v3232_v8, %v4180_v32  ;;  %v1194_v10 = vpop.f32.mrb[5].mxu1 }
 0x207   :  { %v1195_v11 = vadd.f32 %v4180_v32, %v1194_v10  ;;  %3331 = vmatprep.mubr.msk.f32.mxu1 %vm1418_vm6, %v1375_v7 }
 0x208   :  { %v1378_v12 = vmax.f32 %v1200_v9, 0.0  ;;  %3332 = vmatmul.mubr.msk.f32.gmra.mrb[66].mxu1 %vm1418_vm6, %v1376_v6 }
 0x209   :  { %v1377_v13 = vmax.f32 %v1195_v11, 0.0  ;;  %v3235_v14 = vpop.f32.mrb[6].mxu1 }
 0x20a   :  { %v1210_v34 = vadd.f32 %v3235_v14, %v4180_v32  ;;  %v1204_v15 = vpop.f32.mrb[7].mxu1 }
 0x20b   :  { %v1205_v16 = vadd.f32 %v4180_v32, %v1204_v15  ;;  %3334 = vmatprep.mubr.msk.f32.mxu1 %vm1418_vm6, %v1377_v13 }
 0x20c   :  { %v1380_v17 = vmax.f32 %v1210_v34, 0.0  ;;  %3335 = vmatmul.mubr.msk.f32.gmra.mrb[68].mxu1 %vm1418_vm6, %v1378_v12 }
 0x20d   :  { %v1379_v18 = vmax.f32 %v1205_v16, 0.0  ;;  %v3238_v19 = vpop.f32.mrb[8].mxu1 }
 0x20e   :  { %v1220_v20 = vadd.f32 %v3238_v19, %v4180_v32  ;;  %v1214_v21 = vpop.f32.mrb[9].mxu1 }
 0x20f   :  { %v1215_v23 = vadd.f32 %v4180_v32, %v1214_v21  ;;  %3337 = vmatprep.mubr.msk.f32.mxu1 %vm1418_vm6, %v1379_v18 }
 0x210   :  { %v1382_v24 = vmax.f32 %v1220_v20, 0.0  ;;  %3338 = vmatmul.mubr.msk.f32.gmra.mrb[70].mxu1 %vm1418_vm6, %v1380_v17 }
 0x211   :  { %v1381_v25 = vmax.f32 %v1215_v23, 0.0  ;;  %v3241_v26 = vpop.f32.mrb[10].mxu1 }
 0x212   :  { %v1230_v27 = vadd.f32 %v3241_v26, %v4180_v32  ;;  %v1224_v28 = vpop.f32.mrb[11].mxu1 }
 0x213   :  { %v1225_v29 = vadd.f32 %v4180_v32, %v1224_v28  ;;  %3340 = vmatprep.mubr.msk.f32.mxu1 %vm1418_vm6, %v1381_v25 }
 0x214   :  { %v1384_v30 = vmax.f32 %v1230_v27, 0.0  ;;  %3341 = vmatmul.mubr.msk.f32.gmra.mrb[72].mxu1 %vm1418_vm6, %v1382_v24 }
 0x215   :  { %v1383_v31 = vmax.f32 %v1225_v29, 0.0  ;;  %v3244_v33 = vpop.f32.mrb[12].mxu1 }
 0x216   :  { %v1240_v35 = vadd.f32 %v3244_v33, %v4180_v32  ;;  %v1234_v36 = vpop.f32.mrb[13].mxu1 }
 0x217   :  { %v1235_v22 = vadd.f32 %v4180_v32, %v1234_v36  ;;  %3343 = vmatprep.mubr.msk.f32.mxu1 %vm1418_vm6, %v1383_v31 }
 0x218   :  { %v1386_v37 = vmax.f32 %v1240_v35, 0.0  ;;  %3344 = vmatmul.mubr.msk.f32.gmra.mrb[74].mxu1 %vm1418_vm6, %v1384_v30 }
 0x219   :  { %v1385_v38 = vmax.f32 %v1235_v22, 0.0  ;;  %v3247_v39 = vpop.f32.mrb[14].mxu1  ;;  %v4313_v22 = vld [vmem:[%s5153_s6] ss:$0 sm:$0xff] }
 0x21a   :  { %v1250_v40 = vadd.f32 %v3247_v39, %v4180_v32  ;;  %v1244_v41 = vpop.f32.mrb[15].mxu1 }
 0x21b   :  { %v1245_v42 = vadd.f32 %v4180_v32, %v1244_v41  ;;  %3346 = vmatprep.mubr.msk.f32.mxu1 %vm1418_vm6, %v1385_v38 }
 0x21c   :  { %v1388_v43 = vmax.f32 %v1250_v40, 0.0  ;;  %3347 = vmatmul.mubr.msk.f32.gmra.mrb[76].mxu1 %vm1418_vm6, %v1386_v37 }
 0x21d   :  { %v1387_v44 = vmax.f32 %v1245_v42, 0.0  ;;  %v3250_v45 = vpop.f32.mrb[16].mxu1 }
 0x21e   :  { %v1260_v46 = vadd.f32 %v3250_v45, %v4180_v32  ;;  %v1254_v47 = vpop.f32.mrb[17].mxu1 }
 0x21f   :  { %v1255_v48 = vadd.f32 %v4180_v32, %v1254_v47  ;;  %3349 = vmatprep.mubr.msk.f32.mxu1 %vm1418_vm6, %v1387_v44 }
 0x220   :  { %v1390_v49 = vmax.f32 %v1260_v46, 0.0  ;;  %3350 = vmatmul.mubr.msk.f32.gmra.mrb[78].mxu1 %vm1418_vm6, %v1388_v43 }
 0x221   :  { %v1389_v50 = vmax.f32 %v1255_v48, 0.0  ;;  %v3253_v51 = vpop.f32.mrb[18].mxu1 }
 0x222   :  { %v1270_v52 = vadd.f32 %v3253_v51, %v4180_v32  ;;  %v1264_v53 = vpop.f32.mrb[19].mxu1 }
 0x223   :  { %v1265_v54 = vadd.f32 %v4180_v32, %v1264_v53  ;;  %3352 = vmatprep.mubr.msk.f32.mxu1 %vm1418_vm6, %v1389_v50 }
 0x224   :  { %v1392_v55 = vmax.f32 %v1270_v52, 0.0  ;;  %3353 = vmatmul.mubr.msk.f32.gmra.mrb[80].mxu1 %vm1418_vm6, %v1390_v49 }
 0x225   :  { %v1391_v56 = vmax.f32 %v1265_v54, 0.0  ;;  %v3256_v57 = vpop.f32.mrb[20].mxu1 }
 0x226   :  { %v1280_v58 = vadd.f32 %v3256_v57, %v4180_v32  ;;  %v1274_v59 = vpop.f32.mrb[21].mxu1 }
 0x227   :  { %v1275_v60 = vadd.f32 %v4180_v32, %v1274_v59  ;;  %3355 = vmatprep.mubr.msk.f32.mxu1 %vm1418_vm6, %v1391_v56 }
 0x228   :  { %v1394_v61 = vmax.f32 %v1280_v58, 0.0  ;;  %3356 = vmatmul.mubr.msk.f32.gmra.mrb[82].mxu1 %vm1418_vm6, %v1392_v55 }
 0x229   :  { %v1393_v62 = vmax.f32 %v1275_v60, 0.0  ;;  %v3259_v63 = vpop.f32.mrb[22].mxu1 }
 0x22a   :  { %v1290_v0 = vadd.f32 %v3259_v63, %v4180_v32  ;;  %v1284_v1 = vpop.f32.mrb[23].mxu1 }
 0x22b   :  { %v1285_v2 = vadd.f32 %v4180_v32, %v1284_v1  ;;  %3358 = vmatprep.mubr.msk.f32.mxu1 %vm1418_vm6, %v1393_v62 }
 0x22c   :  { %v1396_v3 = vmax.f32 %v1290_v0, 0.0  ;;  %3359 = vmatmul.mubr.msk.f32.gmra.mrb[84].mxu1 %vm1418_vm6, %v1394_v61 }
 0x22d   :  { %v1395_v4 = vmax.f32 %v1285_v2, 0.0  ;;  %v3262_v5 = vpop.f32.mrb[24].mxu1 }
 0x22e   :  { %v1300_v6 = vadd.f32 %v3262_v5, %v4180_v32  ;;  %v1294_v7 = vpop.f32.mrb[25].mxu1 }
 0x22f   :  { %v1295_v8 = vadd.f32 %v4180_v32, %v1294_v7  ;;  %3361 = vmatprep.mubr.msk.f32.mxu1 %vm1418_vm6, %v1395_v4 }
 0x230   :  { %v1398_v9 = vmax.f32 %v1300_v6, 0.0  ;;  %3362 = vmatmul.mubr.msk.f32.gmra.mrb[86].mxu1 %vm1418_vm6, %v1396_v3 }
 0x231   :  { %v1397_v10 = vmax.f32 %v1295_v8, 0.0  ;;  %v3265_v11 = vpop.f32.mrb[26].mxu1 }
 0x232   :  { %v1310_v12 = vadd.f32 %v3265_v11, %v4180_v32  ;;  %v1304_v13 = vpop.f32.mrb[27].mxu1 }
 0x233   :  { %v1305_v14 = vadd.f32 %v4180_v32, %v1304_v13  ;;  %3364 = vmatprep.mubr.msk.f32.mxu1 %vm1418_vm6, %v1397_v10 }
 0x234   :  { %v1400_v34 = vmax.f32 %v1310_v12, 0.0  ;;  %3365 = vmatmul.mubr.msk.f32.gmra.mrb[88].mxu1 %vm1418_vm6, %v1398_v9 }
 0x235   :  { %v1399_v15 = vmax.f32 %v1305_v14, 0.0  ;;  %v3268_v16 = vpop.f32.mrb[28].mxu1 }
 0x236   :  { %v1320_v17 = vadd.f32 %v3268_v16, %v4180_v32  ;;  %v1314_v18 = vpop.f32.mrb[29].mxu1 }
 0x237   :  { %v1315_v19 = vadd.f32 %v4180_v32, %v1314_v18  ;;  %3367 = vmatprep.mubr.msk.f32.mxu1 %vm1418_vm6, %v1399_v15 }
 0x238   :  { %v1402_v20 = vmax.f32 %v1320_v17, 0.0  ;;  %3368 = vmatmul.mubr.msk.f32.gmra.mrb[90].mxu1 %vm1418_vm6, %v1400_v34 }
 0x239   :  { %v1401_v21 = vmax.f32 %v1315_v19, 0.0  ;;  %v3271_v23 = vpop.f32.mrb[30].mxu1 }
 0x23a   :  { %v1330_v24 = vadd.f32 %v3271_v23, %v4180_v32  ;;  %v1324_v25 = vpop.f32.mrb[31].mxu1 }
 0x23b   :  { %v1325_v26 = vadd.f32 %v4180_v32, %v1324_v25  ;;  %3370 = vmatprep.mubr.msk.f32.mxu1 %vm1418_vm6, %v1401_v21 }
 0x23c   :  { %v1404_v27 = vmax.f32 %v1330_v24, 0.0  ;;  %3371 = vmatmul.mubr.msk.f32.gmra.mrb[92].mxu1 %vm1418_vm6, %v1402_v20 }
 0x23d   :  { %v1403_v28 = vmax.f32 %v1325_v26, 0.0  ;;  %v3274_v29 = vpop.f32.mrb[32].mxu1 }
 0x23e   :  { %v1340_v30 = vadd.f32 %v3274_v29, %v4180_v32  ;;  %v1334_v31 = vpop.f32.mrb[33].mxu1 }
 0x23f   :  { %v1335_v33 = vadd.f32 %v4180_v32, %v1334_v31  ;;  %3373 = vmatprep.mubr.msk.f32.mxu1 %vm1418_vm6, %v1403_v28 }
 0x240   :  { %v1406_v35 = vmax.f32 %v1340_v30, 0.0  ;;  %3374 = vmatmul.mubr.msk.f32.gmra.mrb[94].mxu1 %vm1418_vm6, %v1404_v27 }
 0x241   :  { %v1405_v36 = vmax.f32 %v1335_v33, 0.0 }
 0x243   :  { %3376 = vmatprep.mubr.msk.f32.mxu1 %vm1418_vm6, %v1405_v36 }
 0x244   :  { %3377 = vmatmul.mubr.msk.f32.gmra.mrb[96].mxu1 %vm1418_vm6, %v1406_v35 }
 0x29b   :  { %v3285_v37 = vpop.f32.mrb[34].mxu1 }
 0x29c   :  { %v4316_v38 = vadd.f32 %v3285_v37, %v4313_v22  ;;  %v1681_v32 = vpop.f32.mrb[35].mxu1 }
 0x29d   :  { %v4320_v40 = vadd.f32 %v4313_v22, %v1681_v32 }
 0x29e   :  { %2002 = vmax.xlane.f32.xlu0 %v4316_v38 }
 0x29f   :  { %v3288_v39 = vpop.f32.mrb[36].mxu1 }
 0x2a0   :  { %v4323_v41 = vadd.f32 %v3288_v39, %v4313_v22  ;;  %v1691_v42 = vpop.f32.mrb[37].mxu1 }
 0x2a1   :  { %v4328_v44 = vadd.f32 %v4313_v22, %v1691_v42 }
 0x2a2   :  { %2006 = vmax.xlane.f32.xlu1 %v4323_v41  ;;  %2000 = vmax.xlane.f32.xlu0 %v4320_v40 }
 0x2a3   :  { %v3291_v43 = vpop.f32.mrb[38].mxu1 }
 0x2a4   :  { %v1701_v45 = vpop.f32.mrb[39].mxu1  ;;  %v4336_v48 = vadd.f32 %v3291_v43, %v4313_v22 }
 0x2a5   :  { %v4331_v46 = vadd.f32 %v4313_v22, %v1701_v45 }
 0x2a6   :  { %2004 = vmax.xlane.f32.xlu1 %v4328_v44 }
 0x2a7   :  { %v3294_v47 = vpop.f32.mrb[40].mxu1  ;;  %2008 = vmax.xlane.f32.xlu0 %v4331_v46 }
 0x2a8   :  { %v1711_v49 = vpop.f32.mrb[41].mxu1  ;;  %v4344_v52 = vadd.f32 %v3294_v47, %v4313_v22 }
 0x2a9   :  { %v4339_v50 = vadd.f32 %v4313_v22, %v1711_v49 }
 0x2aa   :  { %2010 = vmax.xlane.f32.xlu1 %v4336_v48 }
 0x2ab   :  { %v3297_v51 = vpop.f32.mrb[42].mxu1  ;;  %2012 = vmax.xlane.f32.xlu0 %v4339_v50 }
 0x2ac   :  { %v1721_v53 = vpop.f32.mrb[43].mxu1  ;;  %v4352_v56 = vadd.f32 %v3297_v51, %v4313_v22 }
 0x2ad   :  { %v4347_v54 = vadd.f32 %v4313_v22, %v1721_v53 }
 0x2ae   :  { %2014 = vmax.xlane.f32.xlu1 %v4344_v52 }
 0x2af   :  { %v3300_v55 = vpop.f32.mrb[44].mxu1  ;;  %2016 = vmax.xlane.f32.xlu0 %v4347_v54 }
 0x2b0   :  { %v1731_v57 = vpop.f32.mrb[45].mxu1  ;;  %v4360_v60 = vadd.f32 %v3300_v55, %v4313_v22 }
 0x2b1   :  { %v4355_v58 = vadd.f32 %v4313_v22, %v1731_v57 }
 0x2b2   :  { %2018 = vmax.xlane.f32.xlu1 %v4352_v56 }
 0x2b3   :  { %v3303_v59 = vpop.f32.mrb[46].mxu1  ;;  %2020 = vmax.xlane.f32.xlu0 %v4355_v58 }
 0x2b4   :  { %v1741_v61 = vpop.f32.mrb[47].mxu1  ;;  %v4368_v0 = vadd.f32 %v3303_v59, %v4313_v22 }
 0x2b5   :  { %v4363_v62 = vadd.f32 %v4313_v22, %v1741_v61 }
 0x2b6   :  { %2022 = vmax.xlane.f32.xlu1 %v4360_v60 }
 0x2b7   :  { %v3306_v63 = vpop.f32.mrb[48].mxu1  ;;  %2024 = vmax.xlane.f32.xlu0 %v4363_v62 }
 0x2b8   :  { %v1751_v1 = vpop.f32.mrb[49].mxu1  ;;  %v4376_v4 = vadd.f32 %v3306_v63, %v4313_v22 }
 0x2b9   :  { %v4371_v2 = vadd.f32 %v4313_v22, %v1751_v1 }
 0x2ba   :  { %2026 = vmax.xlane.f32.xlu1 %v4368_v0 }
 0x2bb   :  { %v3309_v3 = vpop.f32.mrb[50].mxu1  ;;  %2028 = vmax.xlane.f32.xlu0 %v4371_v2 }
 0x2bc   :  { %v1761_v5 = vpop.f32.mrb[51].mxu1  ;;  %v4384_v8 = vadd.f32 %v3309_v3, %v4313_v22 }
 0x2bd   :  { %v4379_v6 = vadd.f32 %v4313_v22, %v1761_v5 }
 0x2be   :  { %2030 = vmax.xlane.f32.xlu1 %v4376_v4 }
 0x2bf   :  { %v3312_v7 = vpop.f32.mrb[52].mxu1  ;;  %2032 = vmax.xlane.f32.xlu0 %v4379_v6 }
 0x2c0   :  { %v1771_v9 = vpop.f32.mrb[53].mxu1  ;;  %v4392_v12 = vadd.f32 %v3312_v7, %v4313_v22 }
 0x2c1   :  { %v4387_v10 = vadd.f32 %v4313_v22, %v1771_v9 }
 0x2c2   :  { %2034 = vmax.xlane.f32.xlu1 %v4384_v8 }
 0x2c3   :  { %v3315_v11 = vpop.f32.mrb[54].mxu1  ;;  %2036 = vmax.xlane.f32.xlu0 %v4387_v10 }
 0x2c4   :  { %v1781_v13 = vpop.f32.mrb[55].mxu1  ;;  %v4400_v15 = vadd.f32 %v3315_v11, %v4313_v22 }
 0x2c5   :  { %v4395_v14 = vadd.f32 %v4313_v22, %v1781_v13 }
 0x2c6   :  { %2038 = vmax.xlane.f32.xlu1 %v4392_v12 }
 0x2c7   :  { %v3318_v34 = vpop.f32.mrb[56].mxu1  ;;  %2040 = vmax.xlane.f32.xlu0 %v4395_v14 }
 0x2c8   :  { %v1791_v16 = vpop.f32.mrb[57].mxu1  ;;  %v4408_v19 = vadd.f32 %v3318_v34, %v4313_v22 }
 0x2c9   :  { %v4403_v17 = vadd.f32 %v4313_v22, %v1791_v16 }
 0x2ca   :  { %2042 = vmax.xlane.f32.xlu1 %v4400_v15 }
 0x2cb   :  { %v3321_v18 = vpop.f32.mrb[58].mxu1  ;;  %2044 = vmax.xlane.f32.xlu0 %v4403_v17 }
 0x2cc   :  { %v1801_v20 = vpop.f32.mrb[59].mxu1  ;;  %v4416_v24 = vadd.f32 %v3321_v18, %v4313_v22 }
 0x2cd   :  { %v4411_v21 = vadd.f32 %v4313_v22, %v1801_v20 }
 0x2ce   :  { %2046 = vmax.xlane.f32.xlu1 %v4408_v19 }
 0x2cf   :  { %v3324_v23 = vpop.f32.mrb[60].mxu1  ;;  %2048 = vmax.xlane.f32.xlu0 %v4411_v21 }
 0x2d0   :  { %v1811_v25 = vpop.f32.mrb[61].mxu1  ;;  %v4424_v28 = vadd.f32 %v3324_v23, %v4313_v22 }
 0x2d1   :  { %v4419_v26 = vadd.f32 %v4313_v22, %v1811_v25 }
 0x2d2   :  { %2050 = vmax.xlane.f32.xlu1 %v4416_v24 }
 0x2d3   :  { %v3327_v27 = vpop.f32.mrb[62].mxu1  ;;  %2052 = vmax.xlane.f32.xlu0 %v4419_v26 }
 0x2d4   :  { %v1821_v29 = vpop.f32.mrb[63].mxu1  ;;  %v4432_v33 = vadd.f32 %v3327_v27, %v4313_v22 }
 0x2d5   :  { %v4427_v30 = vadd.f32 %v4313_v22, %v1821_v29 }
 0x2d6   :  { %2054 = vmax.xlane.f32.xlu1 %v4424_v28 }
 0x2d7   :  { %v3330_v31 = vpop.f32.mrb[64].mxu1  ;;  %2056 = vmax.xlane.f32.xlu0 %v4427_v30 }
 0x2d8   :  { %v1831_v35 = vpop.f32.mrb[65].mxu1  ;;  %v4440_v32 = vadd.f32 %v3330_v31, %v4313_v22 }
 0x2d9   :  { %v4435_v36 = vadd.f32 %v4313_v22, %v1831_v35 }
 0x2da   :  { %2058 = vmax.xlane.f32.xlu1 %v4432_v33 }
 0x2db   :  { %v3333_v37 = vpop.f32.mrb[66].mxu1  ;;  %2060 = vmax.xlane.f32.xlu0 %v4435_v36 }
 0x2dc   :  { %v1841_v39 = vpop.f32.mrb[67].mxu1  ;;  %v4448_v45 = vadd.f32 %v3333_v37, %v4313_v22 }
 0x2dd   :  { %v4443_v42 = vadd.f32 %v4313_v22, %v1841_v39 }
 0x2de   :  { %2062 = vmax.xlane.f32.xlu1 %v4440_v32 }
 0x2df   :  { %v3336_v43 = vpop.f32.mrb[68].mxu1  ;;  %2064 = vmax.xlane.f32.xlu0 %v4443_v42 }
 0x2e0   :  { %v1851_v47 = vpop.f32.mrb[69].mxu1  ;;  %v4456_v53 = vadd.f32 %v3336_v43, %v4313_v22 }
 0x2e1   :  { %v4451_v49 = vadd.f32 %v4313_v22, %v1851_v47 }
 0x2e2   :  { %2066 = vmax.xlane.f32.xlu1 %v4448_v45 }
 0x2e3   :  { %v3339_v51 = vpop.f32.mrb[70].mxu1  ;;  %2068 = vmax.xlane.f32.xlu0 %v4451_v49 }
 0x2e4   :  { %v1861_v55 = vpop.f32.mrb[71].mxu1  ;;  %v4464_v61 = vadd.f32 %v3339_v51, %v4313_v22 }
 0x2e5   :  { %v4459_v57 = vadd.f32 %v4313_v22, %v1861_v55 }
 0x2e6   :  { %2070 = vmax.xlane.f32.xlu1 %v4456_v53 }
 0x2e7   :  { %v3342_v59 = vpop.f32.mrb[72].mxu1  ;;  %2072 = vmax.xlane.f32.xlu0 %v4459_v57 }
 0x2e8   :  { %v1871_v63 = vpop.f32.mrb[73].mxu1  ;;  %v4472_v5 = vadd.f32 %v3342_v59, %v4313_v22 }
 0x2e9   :  { %v4467_v1 = vadd.f32 %v4313_v22, %v1871_v63 }
 0x2ea   :  { %2074 = vmax.xlane.f32.xlu1 %v4464_v61 }
 0x2eb   :  { %v3345_v3 = vpop.f32.mrb[74].mxu1  ;;  %2076 = vmax.xlane.f32.xlu0 %v4467_v1 }
 0x2ec   :  { %v1881_v7 = vpop.f32.mrb[75].mxu1  ;;  %v4480_v13 = vadd.f32 %v3345_v3, %v4313_v22 }
 0x2ed   :  { %v4475_v9 = vadd.f32 %v4313_v22, %v1881_v7 }
 0x2ee   :  { %2078 = vmax.xlane.f32.xlu1 %v4472_v5 }
 0x2ef   :  { %v3348_v11 = vpop.f32.mrb[76].mxu1  ;;  %2080 = vmax.xlane.f32.xlu0 %v4475_v9 }
 0x2f0   :  { %v1891_v34 = vpop.f32.mrb[77].mxu1  ;;  %v4488_v20 = vadd.f32 %v3348_v11, %v4313_v22 }
 0x2f1   :  { %v4483_v16 = vadd.f32 %v4313_v22, %v1891_v34 }
 0x2f2   :  { %2082 = vmax.xlane.f32.xlu1 %v4480_v13 }
 0x2f3   :  { %v3351_v18 = vpop.f32.mrb[78].mxu1  ;;  %2084 = vmax.xlane.f32.xlu0 %v4483_v16 }
 0x2f4   :  { %v1901_v23 = vpop.f32.mrb[79].mxu1  ;;  %v4496_v29 = vadd.f32 %v3351_v18, %v4313_v22 }
 0x2f5   :  { %v4491_v25 = vadd.f32 %v4313_v22, %v1901_v23 }
 0x2f6   :  { %2086 = vmax.xlane.f32.xlu1 %v4488_v20 }
 0x2f7   :  { %v3354_v27 = vpop.f32.mrb[80].mxu1  ;;  %2088 = vmax.xlane.f32.xlu0 %v4491_v25 }
 0x2f8   :  { %v1911_v31 = vpop.f32.mrb[81].mxu1  ;;  %v4504_v39 = vadd.f32 %v3354_v27, %v4313_v22 }
 0x2f9   :  { %v4499_v35 = vadd.f32 %v4313_v22, %v1911_v31 }
 0x2fa   :  { %2090 = vmax.xlane.f32.xlu1 %v4496_v29 }
 0x2fb   :  { %v3357_v37 = vpop.f32.mrb[82].mxu1  ;;  %2092 = vmax.xlane.f32.xlu0 %v4499_v35 }
 0x2fc   :  { %v1921_v43 = vpop.f32.mrb[83].mxu1  ;;  %v4512_v55 = vadd.f32 %v3357_v37, %v4313_v22 }
 0x2fd   :  { %v4507_v47 = vadd.f32 %v4313_v22, %v1921_v43 }
 0x2fe   :  { %2094 = vmax.xlane.f32.xlu1 %v4504_v39 }
 0x2ff   :  { %v3360_v51 = vpop.f32.mrb[84].mxu1  ;;  %2096 = vmax.xlane.f32.xlu0 %v4507_v47 }
 0x300   :  { %v1931_v59 = vpop.f32.mrb[85].mxu1  ;;  %v4520_v7 = vadd.f32 %v3360_v51, %v4313_v22 }
 0x301   :  { %v4515_v63 = vadd.f32 %v4313_v22, %v1931_v59 }
 0x302   :  { %2098 = vmax.xlane.f32.xlu1 %v4512_v55  ;;  %5180 = vst [vmem:[#allocation3_spill] sm:$0xff] %v4520_v7 }
 0x303   :  { %5179 = vst [vmem:[#allocation2_spill] sm:$0xff] %v4515_v63  ;;  %v3363_v3 = vpop.f32.mrb[86].mxu1  ;;  %2100 = vmax.xlane.f32.xlu0 %v4515_v63 }
 0x304   :  { %v1941_v11 = vpop.f32.mrb[87].mxu1  ;;  %v4528_v23 = vadd.f32 %v3363_v3, %v4313_v22 }
 0x305   :  { %v4523_v34 = vadd.f32 %v4313_v22, %v1941_v11 }
 0x306   :  { %2102 = vmax.xlane.f32.xlu1 %v4520_v7  ;;  %5182 = vst [vmem:[#allocation5_spill] sm:$0xff] %v4528_v23 }
 0x307   :  { %5181 = vst [vmem:[#allocation4_spill] sm:$0xff] %v4523_v34  ;;  %v3366_v18 = vpop.f32.mrb[88].mxu1  ;;  %2104 = vmax.xlane.f32.xlu0 %v4523_v34 }
 0x308   :  { %v1951_v27 = vpop.f32.mrb[89].mxu1  ;;  %v4536_v43 = vadd.f32 %v3366_v18, %v4313_v22 }
 0x309   :  { %v4531_v31 = vadd.f32 %v4313_v22, %v1951_v27 }
 0x30a   :  { %2106 = vmax.xlane.f32.xlu1 %v4528_v23  ;;  %5184 = vst [vmem:[#allocation7_spill] sm:$0xff] %v4536_v43 }
 0x30b   :  { %5183 = vst [vmem:[#allocation6_spill] sm:$0xff] %v4531_v31  ;;  %v3369_v37 = vpop.f32.mrb[90].mxu1  ;;  %2108 = vmax.xlane.f32.xlu0 %v4531_v31 }
 0x30c   :  { %v1961_v51 = vpop.f32.mrb[91].mxu1  ;;  %v4544_v11 = vadd.f32 %v3369_v37, %v4313_v22 }
 0x30d   :  { %v4539_v59 = vadd.f32 %v4313_v22, %v1961_v51 }
 0x30e   :  { %2110 = vmax.xlane.f32.xlu1 %v4536_v43  ;;  %5186 = vst [vmem:[#allocation9_spill] sm:$0xff] %v4544_v11 }
 0x30f   :  { %5185 = vst [vmem:[#allocation8_spill] sm:$0xff] %v4539_v59  ;;  %v3372_v3 = vpop.f32.mrb[92].mxu1  ;;  %2112 = vmax.xlane.f32.xlu0 %v4539_v59 }
 0x310   :  { %v1971_v27 = vpop.f32.mrb[93].mxu1  ;;  %v4552_v51 = vadd.f32 %v3372_v3, %v4313_v22 }
 0x311   :  { %v4547_v23 = vadd.f32 %v4313_v22, %v1971_v27 }
 0x312   :  { %2114 = vmax.xlane.f32.xlu1 %v4544_v11  ;;  %5188 = vst [vmem:[#allocation11_spill] sm:$0xff] %v4552_v51 }
 0x313   :  { %5187 = vst [vmem:[#allocation10_spill] sm:$0xff] %v4547_v23  ;;  %v3375_v18 = vpop.f32.mrb[94].mxu1  ;;  %2116 = vmax.xlane.f32.xlu0 %v4547_v23 }
 0x314   :  { %v1981_v31 = vpop.f32.mrb[95].mxu1  ;;  %v4560_v27 = vadd.f32 %v3375_v18, %v4313_v22 }
 0x315   :  { %v4555_v43 = vadd.f32 %v4313_v22, %v1981_v31 }
 0x316   :  { %2118 = vmax.xlane.f32.xlu1 %v4552_v51  ;;  %5190 = vst [vmem:[#allocation13_spill] sm:$0xff] %v4560_v27 }
 0x317   :  { %5189 = vst [vmem:[#allocation12_spill] sm:$0xff] %v4555_v43  ;;  %v3378_v37 = vpop.f32.mrb[96].mxu1  ;;  %2120 = vmax.xlane.f32.xlu0 %v4555_v43 }
 0x318   :  { %v1991_v59 = vpop.f32.mrb[97].mxu1  ;;  %v4568_v3 = vadd.f32 %v3378_v37, %v4313_v22 }
 0x319   :  { %v4563_v11 = vadd.f32 %v4313_v22, %v1991_v59 }
 0x31a   :  { %2122 = vmax.xlane.f32.xlu1 %v4560_v27  ;;  %5192 = vst [vmem:[#allocation15_spill] sm:$0xff] %v4568_v3 }
 0x31b   :  { %5191 = vst [vmem:[#allocation14_spill] sm:$0xff] %v4563_v11  ;;  %2124 = vmax.xlane.f32.xlu0 %v4563_v11 }
 0x31e   :  { %2126 = vmax.xlane.f32.xlu1 %v4568_v3 }
 0x32b   :  { %v2003_v31 = vpop.xlane.xlu0 %2002 }
 0x32c   :  { %v2129_v51 = vsub.f32 %v4316_v38, %v2003_v31 }
 0x32e   :  { %v2194_v43 = vmul.f32 1.442695, %v2129_v51 }
 0x32f   :  { %v2007_v23 = vpop.xlane.xlu1 %2006  ;;  %v2001_v18 = vpop.xlane.xlu0 %2000 }
 0x330   :  { %3426 = vpow2.f32 %v2194_v43  ;;  %v2131_v34 = vsub.f32 %v4323_v41, %v2007_v23  ;;  %v2128_v59 = vsub.f32 %v4320_v40, %v2001_v18 }
 0x332   :  { %v2198_v7 = vmul.f32 1.442695, %v2131_v34  ;;  %v2192_v27 = vmul.f32 1.442695, %v2128_v59 }
 0x333   :  { %v2005_v63 = vpop.xlane.xlu1 %2004 }
 0x334   :  { %3428 = vpow2.f32 %v2198_v7  ;;  %v2130_v22 = vsub.f32 %v4328_v44, %v2005_v63  ;;  %v2009_v37 = vpop.xlane.xlu0 %2008 }
 0x335   :  { %3430 = vpow2.f32 %v2192_v27  ;;  %v2132_v3 = vsub.f32 %v4331_v46, %v2009_v37 }
 0x336   :  { %v2196_v11 = vmul.f32 1.442695, %v2130_v22 }
 0x337   :  { %v2011_v38 = vpop.xlane.xlu1 %2010  ;;  %v2200_v31 = vmul.f32 1.442695, %v2132_v3 }
 0x338   :  { %3432 = vpow2.f32 %v2196_v11  ;;  %v2133_v51 = vsub.f32 %v4336_v48, %v2011_v38  ;;  %v2013_v43 = vpop.xlane.xlu0 %2012 }
 0x339   :  { %v2134_v41 = vsub.f32 %v4339_v50, %v2013_v43 }
 0x33a   :  { %v4578_v40 = vpop.eup %3426  ;;  %v2202_v34 = vmul.f32 1.442695, %v2133_v51 }
 0x33b   :  { %2322 = vadd.xlane.f32.xlu1 %v4578_v40  ;;  %v2015_v7 = vpop.xlane.xlu1 %2014  ;;  %v2204_v46 = vmul.f32 1.442695, %v2134_v41 }
 0x33c   :  { %3434 = vpow2.f32 %v2202_v34  ;;  %v2135_v44 = vsub.f32 %v4344_v52, %v2015_v7  ;;  %v2017_v63 = vpop.xlane.xlu0 %2016 }
 0x33d   :  { %3436 = vpow2.f32 %v2200_v31  ;;  %v2136_v23 = vsub.f32 %v4347_v54, %v2017_v63 }
 0x33e   :  { %v4583_v11 = vpop.eup %3428  ;;  %v2206_v48 = vmul.f32 1.442695, %v2135_v44 }
 0x33f   :  { %v4585_v27 = vpop.eup %3430  ;;  %2326 = vadd.xlane.f32.xlu1 %v4583_v11  ;;  %v2019_v50 = vpop.xlane.xlu1 %2018  ;;  %v2208_v52 = vmul.f32 1.442695, %v2136_v23 }
 0x340   :  { %3438 = vpow2.f32 %v2206_v48  ;;  %v2137_v3 = vsub.f32 %v4352_v56, %v2019_v50  ;;  %2320 = vadd.xlane.f32.xlu0 %v4585_v27  ;;  %v2021_v18 = vpop.xlane.xlu0 %2020 }
 0x341   :  { %3440 = vpow2.f32 %v2204_v46  ;;  %v2138_v59 = vsub.f32 %v4355_v58, %v2021_v18 }
 0x342   :  { %v4591_v22 = vpop.eup %3432  ;;  %v2210_v54 = vmul.f32 1.442695, %v2137_v3 }
 0x343   :  { %v2023_v37 = vpop.xlane.xlu1 %2022  ;;  %v2212_v43 = vmul.f32 1.442695, %v2138_v59 }
 0x344   :  { %3442 = vpow2.f32 %v2210_v54  ;;  %v2139_v38 = vsub.f32 %v4360_v60, %v2023_v37  ;;  %2324 = vadd.xlane.f32.xlu0 %v4591_v22  ;;  %v2025_v51 = vpop.xlane.xlu0 %2024 }
 0x345   :  { %3444 = vpow2.f32 %v2208_v52  ;;  %v2140_v56 = vsub.f32 %v4363_v62, %v2025_v51 }
 0x346   :  { %v4596_v31 = vpop.eup %3434  ;;  %v2214_v41 = vmul.f32 1.442695, %v2139_v38 }
 0x347   :  { %v4598_v34 = vpop.eup %3436  ;;  %2330 = vadd.xlane.f32.xlu1 %v4596_v31  ;;  %v2027_v58 = vpop.xlane.xlu1 %2026  ;;  %v2216_v44 = vmul.f32 1.442695, %v2140_v56 }
 0x348   :  { %3446 = vpow2.f32 %v2214_v41  ;;  %v2141_v7 = vsub.f32 %v4368_v0, %v2027_v58  ;;  %2328 = vadd.xlane.f32.xlu0 %v4598_v34  ;;  %v2029_v60 = vpop.xlane.xlu0 %2028 }
 0x349   :  { %3448 = vpow2.f32 %v2212_v43  ;;  %v2142_v63 = vsub.f32 %v4371_v2, %v2029_v60 }
 0x34a   :  { %v4604_v46 = vpop.eup %3438  ;;  %v2218_v62 = vmul.f32 1.442695, %v2141_v7 }
 0x34b   :  { %v4606_v23 = vpop.eup %3440  ;;  %2334 = vadd.xlane.f32.xlu1 %v4604_v46  ;;  %v2031_v48 = vpop.xlane.xlu1 %2030  ;;  %v2220_v3 = vmul.f32 1.442695, %v2142_v63 }
 0x34c   :  { %3450 = vpow2.f32 %v2218_v62  ;;  %v2143_v50 = vsub.f32 %v4376_v4, %v2031_v48  ;;  %2332 = vadd.xlane.f32.xlu0 %v4606_v23  ;;  %v2033_v0 = vpop.xlane.xlu0 %2032 }
 0x34d   :  { %3452 = vpow2.f32 %v2216_v44  ;;  %v2144_v18 = vsub.f32 %v4379_v6, %v2033_v0 }
 0x34e   :  { %v4612_v52 = vpop.eup %3442  ;;  %v2222_v2 = vmul.f32 1.442695, %v2143_v50 }
 0x34f   :  { %v4614_v59 = vpop.eup %3444  ;;  %2338 = vadd.xlane.f32.xlu1 %v4612_v52  ;;  %v2035_v54 = vpop.xlane.xlu1 %2034  ;;  %v2224_v38 = vmul.f32 1.442695, %v2144_v18 }
 0x350   :  { %3454 = vpow2.f32 %v2222_v2  ;;  %v2145_v37 = vsub.f32 %v4384_v8, %v2035_v54  ;;  %2336 = vadd.xlane.f32.xlu0 %v4614_v59  ;;  %v2037_v4 = vpop.xlane.xlu0 %2036 }
 0x351   :  { %3456 = vpow2.f32 %v2220_v3  ;;  %v2146_v51 = vsub.f32 %v4387_v10, %v2037_v4 }
 0x352   :  { %v4620_v43 = vpop.eup %3446  ;;  %v2226_v6 = vmul.f32 1.442695, %v2145_v37 }
 0x353   :  { %v4622_v56 = vpop.eup %3448  ;;  %2342 = vadd.xlane.f32.xlu1 %v4620_v43  ;;  %v2039_v41 = vpop.xlane.xlu1 %2038  ;;  %v2228_v7 = vmul.f32 1.442695, %v2146_v51 }
 0x354   :  { %3458 = vpow2.f32 %v2226_v6  ;;  %v2147_v58 = vsub.f32 %v4392_v12, %v2039_v41  ;;  %2340 = vadd.xlane.f32.xlu0 %v4622_v56  ;;  %v2041_v8 = vpop.xlane.xlu0 %2040 }
 0x355   :  { %3460 = vpow2.f32 %v2224_v38  ;;  %v2148_v60 = vsub.f32 %v4395_v14, %v2041_v8 }
 0x356   :  { %v4628_v44 = vpop.eup %3450  ;;  %v2230_v10 = vmul.f32 1.442695, %v2147_v58 }
 0x357   :  { %v4630_v63 = vpop.eup %3452  ;;  %2346 = vadd.xlane.f32.xlu1 %v4628_v44  ;;  %v2043_v62 = vpop.xlane.xlu1 %2042  ;;  %v2232_v50 = vmul.f32 1.442695, %v2148_v60 }
 0x358   :  { %3462 = vpow2.f32 %v2230_v10  ;;  %v2149_v48 = vsub.f32 %v4400_v15, %v2043_v62  ;;  %2344 = vadd.xlane.f32.xlu0 %v4630_v63  ;;  %v2045_v12 = vpop.xlane.xlu0 %2044 }
 0x359   :  { %3464 = vpow2.f32 %v2228_v7  ;;  %v2150_v0 = vsub.f32 %v4403_v17, %v2045_v12 }
 0x35a   :  { %v4636_v3 = vpop.eup %3454  ;;  %v2234_v14 = vmul.f32 1.442695, %v2149_v48 }
 0x35b   :  { %v4638_v18 = vpop.eup %3456  ;;  %2350 = vadd.xlane.f32.xlu1 %v4636_v3  ;;  %v2047_v2 = vpop.xlane.xlu1 %2046  ;;  %v2236_v37 = vmul.f32 1.442695, %v2150_v0 }
 0x35c   :  { %3466 = vpow2.f32 %v2234_v14  ;;  %v2151_v54 = vsub.f32 %v4408_v19, %v2047_v2  ;;  %2348 = vadd.xlane.f32.xlu0 %v4638_v18  ;;  %v2049_v15 = vpop.xlane.xlu0 %2048 }
 0x35d   :  { %3468 = vpow2.f32 %v2232_v50  ;;  %v2152_v4 = vsub.f32 %v4411_v21, %v2049_v15 }
 0x35e   :  { %v4644_v38 = vpop.eup %3458  ;;  %v2238_v17 = vmul.f32 1.442695, %v2151_v54 }
 0x35f   :  { %v4646_v51 = vpop.eup %3460  ;;  %2354 = vadd.xlane.f32.xlu1 %v4644_v38  ;;  %v2051_v6 = vpop.xlane.xlu1 %2050  ;;  %v2240_v58 = vmul.f32 1.442695, %v2152_v4 }
 0x360   :  { %3470 = vpow2.f32 %v2238_v17  ;;  %v2153_v41 = vsub.f32 %v4416_v24, %v2051_v6  ;;  %2352 = vadd.xlane.f32.xlu0 %v4646_v51  ;;  %v2053_v19 = vpop.xlane.xlu0 %2052 }
 0x361   :  { %3472 = vpow2.f32 %v2236_v37  ;;  %v2154_v8 = vsub.f32 %v4419_v26, %v2053_v19 }
 0x362   :  { %v4652_v7 = vpop.eup %3462  ;;  %v2242_v21 = vmul.f32 1.442695, %v2153_v41 }
 0x363   :  { %v4654_v60 = vpop.eup %3464  ;;  %2358 = vadd.xlane.f32.xlu1 %v4652_v7  ;;  %v2055_v10 = vpop.xlane.xlu1 %2054  ;;  %v2244_v48 = vmul.f32 1.442695, %v2154_v8 }
 0x364   :  { %3474 = vpow2.f32 %v2242_v21  ;;  %v2155_v62 = vsub.f32 %v4424_v28, %v2055_v10  ;;  %2356 = vadd.xlane.f32.xlu0 %v4654_v60  ;;  %v2057_v24 = vpop.xlane.xlu0 %2056 }
 0x365   :  { %3476 = vpow2.f32 %v2240_v58  ;;  %v2156_v12 = vsub.f32 %v4427_v30, %v2057_v24 }
 0x366   :  { %v4660_v50 = vpop.eup %3466  ;;  %v2246_v26 = vmul.f32 1.442695, %v2155_v62 }
 0x367   :  { %v4662_v0 = vpop.eup %3468  ;;  %2362 = vadd.xlane.f32.xlu1 %v4660_v50  ;;  %v2059_v14 = vpop.xlane.xlu1 %2058  ;;  %v2248_v54 = vmul.f32 1.442695, %v2156_v12 }
 0x368   :  { %3478 = vpow2.f32 %v2246_v26  ;;  %v2157_v2 = vsub.f32 %v4432_v33, %v2059_v14  ;;  %2360 = vadd.xlane.f32.xlu0 %v4662_v0  ;;  %v2061_v28 = vpop.xlane.xlu0 %2060 }
 0x369   :  { %3480 = vpow2.f32 %v2244_v48  ;;  %v2158_v15 = vsub.f32 %v4435_v36, %v2061_v28 }
 0x36a   :  { %v4668_v37 = vpop.eup %3470  ;;  %v2250_v30 = vmul.f32 1.442695, %v2157_v2 }
 0x36b   :  { %v4670_v4 = vpop.eup %3472  ;;  %2366 = vadd.xlane.f32.xlu1 %v4668_v37  ;;  %v2063_v17 = vpop.xlane.xlu1 %2062  ;;  %v2252_v41 = vmul.f32 1.442695, %v2158_v15 }
 0x36c   :  { %3482 = vpow2.f32 %v2250_v30  ;;  %v2159_v6 = vsub.f32 %v4440_v32, %v2063_v17  ;;  %2364 = vadd.xlane.f32.xlu0 %v4670_v4  ;;  %v2065_v33 = vpop.xlane.xlu0 %2064 }
 0x36d   :  { %3484 = vpow2.f32 %v2248_v54  ;;  %v2160_v19 = vsub.f32 %v4443_v42, %v2065_v33 }
 0x36e   :  { %v4676_v58 = vpop.eup %3474  ;;  %v2254_v36 = vmul.f32 1.442695, %v2159_v6 }
 0x36f   :  { %v4678_v8 = vpop.eup %3476  ;;  %2370 = vadd.xlane.f32.xlu1 %v4676_v58  ;;  %v2067_v21 = vpop.xlane.xlu1 %2066  ;;  %v2256_v62 = vmul.f32 1.442695, %v2160_v19 }
 0x370   :  { %3486 = vpow2.f32 %v2254_v36  ;;  %v2161_v10 = vsub.f32 %v4448_v45, %v2067_v21  ;;  %2368 = vadd.xlane.f32.xlu0 %v4678_v8  ;;  %v2069_v32 = vpop.xlane.xlu0 %2068 }
 0x371   :  { %3488 = vpow2.f32 %v2252_v41  ;;  %v2162_v24 = vsub.f32 %v4451_v49, %v2069_v32 }
 0x372   :  { %v4684_v48 = vpop.eup %3478  ;;  %v2258_v42 = vmul.f32 1.442695, %v2161_v10 }
 0x373   :  { %v4686_v12 = vpop.eup %3480  ;;  %2374 = vadd.xlane.f32.xlu1 %v4684_v48  ;;  %v2071_v26 = vpop.xlane.xlu1 %2070  ;;  %v2260_v2 = vmul.f32 1.442695, %v2162_v24 }
 0x374   :  { %3490 = vpow2.f32 %v2258_v42  ;;  %v2163_v14 = vsub.f32 %v4456_v53, %v2071_v26  ;;  %2372 = vadd.xlane.f32.xlu0 %v4686_v12  ;;  %v2073_v45 = vpop.xlane.xlu0 %2072 }
 0x375   :  { %3492 = vpow2.f32 %v2256_v62  ;;  %v2164_v28 = vsub.f32 %v4459_v57, %v2073_v45 }
 0x376   :  { %v4692_v54 = vpop.eup %3482  ;;  %v2262_v49 = vmul.f32 1.442695, %v2163_v14 }
 0x377   :  { %v4694_v15 = vpop.eup %3484  ;;  %2378 = vadd.xlane.f32.xlu1 %v4692_v54  ;;  %v2075_v30 = vpop.xlane.xlu1 %2074  ;;  %v2264_v6 = vmul.f32 1.442695, %v2164_v28 }
 0x378   :  { %3494 = vpow2.f32 %v2262_v49  ;;  %v2165_v17 = vsub.f32 %v4464_v61, %v2075_v30  ;;  %2376 = vadd.xlane.f32.xlu0 %v4694_v15  ;;  %v2077_v53 = vpop.xlane.xlu0 %2076 }
 0x379   :  { %3496 = vpow2.f32 %v2260_v2  ;;  %v2166_v33 = vsub.f32 %v4467_v1, %v2077_v53 }
 0x37a   :  { %v4700_v41 = vpop.eup %3486  ;;  %v2266_v57 = vmul.f32 1.442695, %v2165_v17 }
 0x37b   :  { %v4702_v19 = vpop.eup %3488  ;;  %2382 = vadd.xlane.f32.xlu1 %v4700_v41  ;;  %v2079_v36 = vpop.xlane.xlu1 %2078  ;;  %v2268_v10 = vmul.f32 1.442695, %v2166_v33 }
 0x37c   :  { %3498 = vpow2.f32 %v2266_v57  ;;  %v2167_v21 = vsub.f32 %v4472_v5, %v2079_v36  ;;  %2380 = vadd.xlane.f32.xlu0 %v4702_v19  ;;  %v2081_v61 = vpop.xlane.xlu0 %2080 }
 0x37d   :  { %3500 = vpow2.f32 %v2264_v6  ;;  %v2168_v32 = vsub.f32 %v4475_v9, %v2081_v61 }
 0x37e   :  { %v4708_v62 = vpop.eup %3490  ;;  %v2270_v1 = vmul.f32 1.442695, %v2167_v21 }
 0x37f   :  { %v4710_v24 = vpop.eup %3492  ;;  %2386 = vadd.xlane.f32.xlu1 %v4708_v62  ;;  %v2083_v42 = vpop.xlane.xlu1 %2082  ;;  %v2272_v14 = vmul.f32 1.442695, %v2168_v32 }
 0x380   :  { %3502 = vpow2.f32 %v2270_v1  ;;  %v2169_v26 = vsub.f32 %v4480_v13, %v2083_v42  ;;  %2384 = vadd.xlane.f32.xlu0 %v4710_v24  ;;  %v2085_v5 = vpop.xlane.xlu0 %2084 }
 0x381   :  { %3504 = vpow2.f32 %v2268_v10  ;;  %v2170_v45 = vsub.f32 %v4483_v16, %v2085_v5 }
 0x382   :  { %v4716_v2 = vpop.eup %3494  ;;  %v2274_v9 = vmul.f32 1.442695, %v2169_v26 }
 0x383   :  { %v4718_v28 = vpop.eup %3496  ;;  %2390 = vadd.xlane.f32.xlu1 %v4716_v2  ;;  %v2087_v49 = vpop.xlane.xlu1 %2086  ;;  %v2276_v17 = vmul.f32 1.442695, %v2170_v45 }
 0x384   :  { %3506 = vpow2.f32 %v2274_v9  ;;  %v2171_v30 = vsub.f32 %v4488_v20, %v2087_v49  ;;  %2388 = vadd.xlane.f32.xlu0 %v4718_v28  ;;  %v2089_v13 = vpop.xlane.xlu0 %2088 }
 0x385   :  { %3508 = vpow2.f32 %v2272_v14  ;;  %v2172_v53 = vsub.f32 %v4491_v25, %v2089_v13  ;;  %v5193_v13 = vld [vmem:[#allocation2_spill] sm:$0xff] }
 0x386   :  { %v4724_v6 = vpop.eup %3498  ;;  %v2278_v16 = vmul.f32 1.442695, %v2171_v30 }
 0x387   :  { %v4726_v33 = vpop.eup %3500  ;;  %2394 = vadd.xlane.f32.xlu1 %v4724_v6  ;;  %v2091_v57 = vpop.xlane.xlu1 %2090  ;;  %v2280_v21 = vmul.f32 1.442695, %v2172_v53 }
 0x388   :  { %3510 = vpow2.f32 %v2278_v16  ;;  %v2173_v36 = vsub.f32 %v4496_v29, %v2091_v57  ;;  %2392 = vadd.xlane.f32.xlu0 %v4726_v33  ;;  %v2093_v20 = vpop.xlane.xlu0 %2092 }
 0x389   :  { %3512 = vpow2.f32 %v2276_v17  ;;  %v2174_v61 = vsub.f32 %v4499_v35, %v2093_v20 }
 0x38a   :  { %v4732_v10 = vpop.eup %3502  ;;  %v2282_v25 = vmul.f32 1.442695, %v2173_v36  ;;  %v5194_v36 = vld [vmem:[#allocation3_spill] sm:$0xff] }
 0x38b   :  { %v4734_v32 = vpop.eup %3504  ;;  %2398 = vadd.xlane.f32.xlu1 %v4732_v10  ;;  %v2095_v1 = vpop.xlane.xlu1 %2094  ;;  %v2284_v26 = vmul.f32 1.442695, %v2174_v61  ;;  %v5195_v61 = vld [vmem:[#allocation4_spill] sm:$0xff] }
 0x38c   :  { %3514 = vpow2.f32 %v2282_v25  ;;  %v2175_v42 = vsub.f32 %v4504_v39, %v2095_v1  ;;  %2396 = vadd.xlane.f32.xlu0 %v4734_v32  ;;  %v2097_v29 = vpop.xlane.xlu0 %2096 }
 0x38d   :  { %3516 = vpow2.f32 %v2280_v21  ;;  %v2176_v5 = vsub.f32 %v4507_v47, %v2097_v29 }
 0x38e   :  { %v4740_v14 = vpop.eup %3506  ;;  %v2286_v35 = vmul.f32 1.442695, %v2175_v42 }
 0x38f   :  { %v4742_v45 = vpop.eup %3508  ;;  %2402 = vadd.xlane.f32.xlu1 %v4740_v14  ;;  %v2099_v9 = vpop.xlane.xlu1 %2098  ;;  %v2288_v30 = vmul.f32 1.442695, %v2176_v5  ;;  %v5196_v5 = vld [vmem:[#allocation5_spill] sm:$0xff] }
 0x390   :  { %3518 = vpow2.f32 %v2286_v35  ;;  %v2177_v49 = vsub.f32 %v4512_v55, %v2099_v9  ;;  %2400 = vadd.xlane.f32.xlu0 %v4742_v45  ;;  %v2101_v39 = vpop.xlane.xlu0 %2100 }
 0x391   :  { %3520 = vpow2.f32 %v2284_v26  ;;  %v2178_v17 = vsub.f32 %v5193_v13, %v2101_v39  ;;  %v5197_v39 = vld [vmem:[#allocation6_spill] sm:$0xff] }
 0x392   :  { %v4748_v53 = vpop.eup %3510  ;;  %v2290_v47 = vmul.f32 1.442695, %v2177_v49 }
 0x393   :  { %v4750_v16 = vpop.eup %3512  ;;  %2406 = vadd.xlane.f32.xlu1 %v4748_v53  ;;  %v2103_v57 = vpop.xlane.xlu1 %2102  ;;  %v2292_v21 = vmul.f32 1.442695, %v2178_v17 }
 0x394   :  { %3522 = vpow2.f32 %v2290_v47  ;;  %v2179_v20 = vsub.f32 %v5194_v36, %v2103_v57  ;;  %2404 = vadd.xlane.f32.xlu0 %v4750_v16  ;;  %v2105_v55 = vpop.xlane.xlu0 %2104  ;;  %v5198_v36 = vld [vmem:[#allocation7_spill] sm:$0xff] }
 0x395   :  { %3524 = vpow2.f32 %v2288_v30  ;;  %v2180_v25 = vsub.f32 %v5195_v61, %v2105_v55 }
 0x396   :  { %v4756_v1 = vpop.eup %3514  ;;  %v2294_v42 = vmul.f32 1.442695, %v2179_v20 }
 0x397   :  { %v4758_v29 = vpop.eup %3516  ;;  %2410 = vadd.xlane.f32.xlu1 %v4756_v1  ;;  %v2107_v26 = vpop.xlane.xlu1 %2106  ;;  %v2296_v49 = vmul.f32 1.442695, %v2180_v25 }
 0x398   :  { %3526 = vpow2.f32 %v2294_v42  ;;  %v2181_v35 = vsub.f32 %v5196_v5, %v2107_v26  ;;  %2408 = vadd.xlane.f32.xlu0 %v4758_v29  ;;  %v2109_v9 = vpop.xlane.xlu0 %2108 }
 0x399   :  { %3528 = vpow2.f32 %v2292_v21  ;;  %v2182_v30 = vsub.f32 %v5197_v39, %v2109_v9  ;;  %v5199_v21 = vld [vmem:[#allocation8_spill] sm:$0xff]  ;;  %v5202_v9 = vld [vmem:[#allocation9_spill] sm:$0xff] }
 0x39a   :  { %v4764_v13 = vpop.eup %3518  ;;  %v2298_v17 = vmul.f32 1.442695, %v2181_v35 }
 0x39b   :  { %v4766_v47 = vpop.eup %3520  ;;  %2414 = vadd.xlane.f32.xlu1 %v4764_v13  ;;  %v2111_v57 = vpop.xlane.xlu1 %2110  ;;  %v2300_v61 = vmul.f32 1.442695, %v2182_v30 }
 0x39c   :  { %3530 = vpow2.f32 %v2298_v17  ;;  %v2183_v20 = vsub.f32 %v5198_v36, %v2111_v57  ;;  %2412 = vadd.xlane.f32.xlu0 %v4766_v47  ;;  %v2113_v55 = vpop.xlane.xlu0 %2112 }
 0x39d   :  { %3532 = vpow2.f32 %v2296_v49  ;;  %v2184_v25 = vsub.f32 %v5199_v21, %v2113_v55  ;;  %v5203_v49 = vld [vmem:[#allocation10_spill] sm:$0xff] }
 0x39e   :  { %v4772_v42 = vpop.eup %3522  ;;  %v2302_v26 = vmul.f32 1.442695, %v2183_v20 }
 0x39f   :  { %5200 = vst [vmem:[#allocation2_spill] sm:$0xff] %v4772_v42  ;;  %v4774_v5 = vpop.eup %3524  ;;  %2418 = vadd.xlane.f32.xlu1 %v4772_v42  ;;  %v2115_v35 = vpop.xlane.xlu1 %2114  ;;  %v2304_v57 = vmul.f32 1.442695, %v2184_v25  ;;  %v5206_v42 = vld [vmem:[#allocation11_spill] sm:$0xff] }
 0x3a0   :  { %5201 = vst [vmem:[#allocation3_spill] sm:$0xff] %v4774_v5  ;;  %3534 = vpow2.f32 %v2302_v26  ;;  %v2185_v39 = vsub.f32 %v5202_v9, %v2115_v35  ;;  %2416 = vadd.xlane.f32.xlu0 %v4774_v5  ;;  %v2117_v17 = vpop.xlane.xlu0 %2116 }
 0x3a1   :  { %3536 = vpow2.f32 %v2300_v61  ;;  %v2186_v30 = vsub.f32 %v5203_v49, %v2117_v17  ;;  %v5207_v61 = vld [vmem:[#allocation12_spill] sm:$0xff] }
 0x3a2   :  { %v4780_v36 = vpop.eup %3526  ;;  %v2306_v55 = vmul.f32 1.442695, %v2185_v39 }
 0x3a3   :  { %5204 = vst [vmem:[#allocation4_spill] sm:$0xff] %v4780_v36  ;;  %v4782_v21 = vpop.eup %3528  ;;  %2422 = vadd.xlane.f32.xlu1 %v4780_v36  ;;  %v2119_v20 = vpop.xlane.xlu1 %2118  ;;  %v2308_v9 = vmul.f32 1.442695, %v2186_v30  ;;  %v5209_v36 = vld [vmem:[#allocation13_spill] sm:$0xff] }
 0x3a4   :  { %5205 = vst [vmem:[#allocation5_spill] sm:$0xff] %v4782_v21  ;;  %3538 = vpow2.f32 %v2306_v55  ;;  %v2187_v26 = vsub.f32 %v5206_v42, %v2119_v20  ;;  %2420 = vadd.xlane.f32.xlu0 %v4782_v21  ;;  %v2121_v35 = vpop.xlane.xlu0 %2120 }
 0x3a5   :  { %3540 = vpow2.f32 %v2304_v57  ;;  %v2188_v25 = vsub.f32 %v5207_v61, %v2121_v35  ;;  %v5210_v57 = vld [vmem:[#allocation14_spill] sm:$0xff] }
 0x3a6   :  { %v4788_v5 = vpop.eup %3530  ;;  %v2310_v17 = vmul.f32 1.442695, %v2187_v26 }
 0x3a7   :  { %5208 = vst [vmem:[#allocation6_spill] sm:$0xff] %v4788_v5  ;;  %v4790_v49 = vpop.eup %3532  ;;  %2426 = vadd.xlane.f32.xlu1 %v4788_v5  ;;  %v2123_v39 = vpop.xlane.xlu1 %2122  ;;  %v2312_v20 = vmul.f32 1.442695, %v2188_v25  ;;  %v5211_v5 = vld [vmem:[#allocation15_spill] sm:$0xff] }
 0x3a8   :  { %3542 = vpow2.f32 %v2310_v17  ;;  %v2189_v55 = vsub.f32 %v5209_v36, %v2123_v39  ;;  %2424 = vadd.xlane.f32.xlu0 %v4790_v49  ;;  %v2125_v42 = vpop.xlane.xlu0 %2124 }
 0x3a9   :  { %3544 = vpow2.f32 %v2308_v9  ;;  %v2190_v30 = vsub.f32 %v5210_v57, %v2125_v42 }
 0x3aa   :  { %v4796_v21 = vpop.eup %3534  ;;  %v2314_v35 = vmul.f32 1.442695, %v2189_v55 }
 0x3ab   :  { %v4798_v61 = vpop.eup %3536  ;;  %2430 = vadd.xlane.f32.xlu1 %v4796_v21  ;;  %v2127_v26 = vpop.xlane.xlu1 %2126  ;;  %v2316_v36 = vmul.f32 1.442695, %v2190_v30 }
 0x3ac   :  { %3546 = vpow2.f32 %v2314_v35  ;;  %v2191_v17 = vsub.f32 %v5211_v5, %v2127_v26  ;;  %2428 = vadd.xlane.f32.xlu0 %v4798_v61 }
 0x3ad   :  { %3548 = vpow2.f32 %v2312_v20 }
 0x3ae   :  { %v4803_v39 = vpop.eup %3538  ;;  %v2318_v9 = vmul.f32 1.442695, %v2191_v17 }
 0x3af   :  { %v4805_v25 = vpop.eup %3540  ;;  %2434 = vadd.xlane.f32.xlu1 %v4803_v39 }
 0x3b0   :  { %3550 = vpow2.f32 %v2318_v9  ;;  %2432 = vadd.xlane.f32.xlu0 %v4805_v25 }
 0x3b1   :  { %3552 = vpow2.f32 %v2316_v36 }
 0x3b2   :  { %v4809_v55 = vpop.eup %3542 }
 0x3b3   :  { %v4811_v42 = vpop.eup %3544  ;;  %2438 = vadd.xlane.f32.xlu1 %v4809_v55 }
 0x3b4   :  { %5212 = vst [vmem:[#allocation7_spill] sm:$0xff] %v4811_v42  ;;  %2436 = vadd.xlane.f32.xlu0 %v4811_v42 }
 0x3b6   :  { %v4815_v5 = vpop.eup %3546 }
 0x3b7   :  { %5213 = vst [vmem:[#allocation8_spill] sm:$0xff] %v4815_v5  ;;  %v4817_v20 = vpop.eup %3548  ;;  %2442 = vadd.xlane.f32.xlu1 %v4815_v5 }
 0x3b8   :  { %5214 = vst [vmem:[#allocation9_spill] sm:$0xff] %v4817_v20  ;;  %2440 = vadd.xlane.f32.xlu0 %v4817_v20 }
 0x3ba   :  { %v4821_v57 = vpop.eup %3550 }
 0x3bb   :  { %5215 = vst [vmem:[#allocation10_spill] sm:$0xff] %v4821_v57  ;;  %v4823_v30 = vpop.eup %3552  ;;  %2446 = vadd.xlane.f32.xlu1 %v4821_v57 }
 0x3bc   :  { %5216 = vst [vmem:[#allocation11_spill] sm:$0xff] %v4823_v30  ;;  %2444 = vadd.xlane.f32.xlu0 %v4823_v30 }
 0x3c8   :  { %v2323_v35 = vpop.xlane.xlu1 %2322 }
 0x3c9   :  { %3554 = vrcp.f32 %v2323_v35 }
 0x3cc   :  { %v2327_v26 = vpop.xlane.xlu1 %2326 }
 0x3cd   :  { %3556 = vrcp.f32 %v2327_v26  ;;  %v2321_v17 = vpop.xlane.xlu0 %2320 }
 0x3ce   :  { %3558 = vrcp.f32 %v2321_v17 }
 0x3d1   :  { %v2325_v36 = vpop.xlane.xlu0 %2324 }
 0x3d2   :  { %3560 = vrcp.f32 %v2325_v36 }
 0x3d3   :  { %v3555_v9 = vpop.eup %3554 }
 0x3d4   :  { %v2451_v20 = vmul.f32 %v3555_v9, %v4578_v40  ;;  %v2331_v5 = vpop.xlane.xlu1 %2330 }
 0x3d5   :  { %3562 = vrcp.f32 %v2331_v5  ;;  %v2329_v42 = vpop.xlane.xlu0 %2328 }
 0x3d6   :  { %2578 = vst.msk [vmem:[%s5154_s7 + $0x8] sm:$0xff] %vm2576_vm7, %v2451_v20  ;;  %3564 = vrcp.f32 %v2329_v42 }
 0x3d7   :  { %v3557_v35 = vpop.eup %3556 }
 0x3d8   :  { %v3559_v30 = vpop.eup %3558  ;;  %v2455_v26 = vmul.f32 %v3557_v35, %v4583_v11  ;;  %v2335_v17 = vpop.xlane.xlu1 %2334 }
 0x3d9   :  { %v2449_v36 = vmul.f32 %v3559_v30, %v4585_v27  ;;  %3566 = vrcp.f32 %v2335_v17  ;;  %v2333_v57 = vpop.xlane.xlu0 %2332 }
 0x3da   :  { %2580 = vst.msk [vmem:[%s5154_s7 + $0x18] sm:$0xff] %vm2576_vm7, %v2455_v26  ;;  %3568 = vrcp.f32 %v2333_v57 }
 0x3db   :  { %2577 = vst.msk [vmem:[%s5154_s7] sm:$0xff] %vm2576_vm7, %v2449_v36 }
 0x3dc   :  { %v3561_v40 = vpop.eup %3560  ;;  %v2339_v42 = vpop.xlane.xlu1 %2338 }
 0x3dd   :  { %v2453_v11 = vmul.f32 %v3561_v40, %v4591_v22  ;;  %3570 = vrcp.f32 %v2339_v42  ;;  %v2337_v5 = vpop.xlane.xlu0 %2336 }
 0x3de   :  { %3572 = vrcp.f32 %v2337_v5 }
 0x3df   :  { %v3563_v27 = vpop.eup %3562  ;;  %2579 = vst.msk [vmem:[%s5154_s7 + $0x10] sm:$0xff] %vm2576_vm7, %v2453_v11 }
 0x3e0   :  { %v3565_v20 = vpop.eup %3564  ;;  %v2459_v57 = vmul.f32 %v3563_v27, %v4596_v31  ;;  %v2343_v30 = vpop.xlane.xlu1 %2342 }
 0x3e1   :  { %v2457_v9 = vmul.f32 %v3565_v20, %v4598_v34  ;;  %3574 = vrcp.f32 %v2343_v30  ;;  %v2341_v35 = vpop.xlane.xlu0 %2340 }
 0x3e2   :  { %2582 = vst.msk [vmem:[%s5154_s7 + $0x28] sm:$0xff] %vm2576_vm7, %v2459_v57  ;;  %3576 = vrcp.f32 %v2341_v35 }
 0x3e3   :  { %v3567_v22 = vpop.eup %3566  ;;  %2581 = vst.msk [vmem:[%s5154_s7 + $0x20] sm:$0xff] %vm2576_vm7, %v2457_v9 }
 0x3e4   :  { %v3569_v26 = vpop.eup %3568  ;;  %v2463_v31 = vmul.f32 %v3567_v22, %v4604_v46  ;;  %v2347_v17 = vpop.xlane.xlu1 %2346 }
 0x3e5   :  { %v2461_v34 = vmul.f32 %v3569_v26, %v4606_v23  ;;  %3578 = vrcp.f32 %v2347_v17  ;;  %v2345_v36 = vpop.xlane.xlu0 %2344 }
 0x3e6   :  { %2584 = vst.msk [vmem:[%s5154_s7 + $0x38] sm:$0xff] %vm2576_vm7, %v2463_v31  ;;  %3580 = vrcp.f32 %v2345_v36 }
 0x3e7   :  { %v3571_v40 = vpop.eup %3570  ;;  %2583 = vst.msk [vmem:[%s5154_s7 + $0x30] sm:$0xff] %vm2576_vm7, %v2461_v34 }
 0x3e8   :  { %v3573_v42 = vpop.eup %3572  ;;  %v2467_v46 = vmul.f32 %v3571_v40, %v4612_v52  ;;  %v2351_v11 = vpop.xlane.xlu1 %2350 }
 0x3e9   :  { %v2465_v23 = vmul.f32 %v3573_v42, %v4614_v59  ;;  %3582 = vrcp.f32 %v2351_v11  ;;  %v2349_v5 = vpop.xlane.xlu0 %2348 }
 0x3ea   :  { %2586 = vst.msk [vmem:[%s5154_s7 + $0x48] sm:$0xff] %vm2576_vm7, %v2467_v46  ;;  %3584 = vrcp.f32 %v2349_v5 }
 0x3eb   :  { %v3575_v27 = vpop.eup %3574  ;;  %2585 = vst.msk [vmem:[%s5154_s7 + $0x40] sm:$0xff] %vm2576_vm7, %v2465_v23 }
 0x3ec   :  { %v3577_v20 = vpop.eup %3576  ;;  %v2471_v52 = vmul.f32 %v3575_v27, %v4620_v43  ;;  %v2355_v57 = vpop.xlane.xlu1 %2354 }
 0x3ed   :  { %v2469_v59 = vmul.f32 %v3577_v20, %v4622_v56  ;;  %3586 = vrcp.f32 %v2355_v57  ;;  %v2353_v30 = vpop.xlane.xlu0 %2352 }
 0x3ee   :  { %2588 = vst.msk [vmem:[%s5154_s7 + $0x58] sm:$0xff] %vm2576_vm7, %v2471_v52  ;;  %3588 = vrcp.f32 %v2353_v30 }
 0x3ef   :  { %v3579_v9 = vpop.eup %3578  ;;  %2587 = vst.msk [vmem:[%s5154_s7 + $0x50] sm:$0xff] %vm2576_vm7, %v2469_v59 }
 0x3f0   :  { %v3581_v35 = vpop.eup %3580  ;;  %v2475_v43 = vmul.f32 %v3579_v9, %v4628_v44  ;;  %v2359_v22 = vpop.xlane.xlu1 %2358 }
 0x3f1   :  { %v2473_v56 = vmul.f32 %v3581_v35, %v4630_v63  ;;  %3590 = vrcp.f32 %v2359_v22  ;;  %v2357_v26 = vpop.xlane.xlu0 %2356 }
 0x3f2   :  { %2590 = vst.msk [vmem:[%s5154_s7 + $0x68] sm:$0xff] %vm2576_vm7, %v2475_v43  ;;  %3592 = vrcp.f32 %v2357_v26 }
 0x3f3   :  { %v3583_v31 = vpop.eup %3582  ;;  %2589 = vst.msk [vmem:[%s5154_s7 + $0x60] sm:$0xff] %vm2576_vm7, %v2473_v56 }
 0x3f4   :  { %v3585_v17 = vpop.eup %3584  ;;  %v2479_v44 = vmul.f32 %v3583_v31, %v4636_v3  ;;  %v2363_v34 = vpop.xlane.xlu1 %2362 }
 0x3f5   :  { %v2477_v63 = vmul.f32 %v3585_v17, %v4638_v18  ;;  %3594 = vrcp.f32 %v2363_v34  ;;  %v2361_v36 = vpop.xlane.xlu0 %2360 }
 0x3f6   :  { %2592 = vst.msk [vmem:[%s5154_s7 + $0x78] sm:$0xff] %vm2576_vm7, %v2479_v44  ;;  %3596 = vrcp.f32 %v2361_v36 }
 0x3f7   :  { %v3587_v40 = vpop.eup %3586  ;;  %2591 = vst.msk [vmem:[%s5154_s7 + $0x70] sm:$0xff] %vm2576_vm7, %v2477_v63 }
 0x3f8   :  { %v3589_v42 = vpop.eup %3588  ;;  %v2483_v3 = vmul.f32 %v3587_v40, %v4644_v38  ;;  %v2367_v46 = vpop.xlane.xlu1 %2366 }
 0x3f9   :  { %v2481_v18 = vmul.f32 %v3589_v42, %v4646_v51  ;;  %3598 = vrcp.f32 %v2367_v46  ;;  %v2365_v11 = vpop.xlane.xlu0 %2364 }
 0x3fa   :  { %2594 = vst.msk [vmem:[%s5154_s7 + $0x88] sm:$0xff] %vm2576_vm7, %v2483_v3  ;;  %3600 = vrcp.f32 %v2365_v11 }
 0x3fb   :  { %v3591_v23 = vpop.eup %3590  ;;  %2593 = vst.msk [vmem:[%s5154_s7 + $0x80] sm:$0xff] %vm2576_vm7, %v2481_v18 }
 0x3fc   :  { %v3593_v5 = vpop.eup %3592  ;;  %v2487_v38 = vmul.f32 %v3591_v23, %v4652_v7  ;;  %v2371_v27 = vpop.xlane.xlu1 %2370 }
 0x3fd   :  { %v2485_v51 = vmul.f32 %v3593_v5, %v4654_v60  ;;  %3602 = vrcp.f32 %v2371_v27  ;;  %v2369_v20 = vpop.xlane.xlu0 %2368 }
 0x3fe   :  { %2596 = vst.msk [vmem:[%s5154_s7 + $0x98] sm:$0xff] %vm2576_vm7, %v2487_v38  ;;  %3604 = vrcp.f32 %v2369_v20 }
 0x3ff   :  { %v3595_v52 = vpop.eup %3594  ;;  %2595 = vst.msk [vmem:[%s5154_s7 + $0x90] sm:$0xff] %vm2576_vm7, %v2485_v51 }
 0x400   :  { %v3597_v57 = vpop.eup %3596  ;;  %v2491_v7 = vmul.f32 %v3595_v52, %v4660_v50  ;;  %v2375_v59 = vpop.xlane.xlu1 %2374 }
 0x401   :  { %v2489_v60 = vmul.f32 %v3597_v57, %v4662_v0  ;;  %3606 = vrcp.f32 %v2375_v59  ;;  %v2373_v30 = vpop.xlane.xlu0 %2372 }
 0x402   :  { %2598 = vst.msk [vmem:[%s5154_s7 + $0xa8] sm:$0xff] %vm2576_vm7, %v2491_v7  ;;  %3608 = vrcp.f32 %v2373_v30 }
 0x403   :  { %v3599_v9 = vpop.eup %3598  ;;  %2597 = vst.msk [vmem:[%s5154_s7 + $0xa0] sm:$0xff] %vm2576_vm7, %v2489_v60 }
 0x404   :  { %v3601_v35 = vpop.eup %3600  ;;  %v2495_v50 = vmul.f32 %v3599_v9, %v4668_v37  ;;  %v2379_v43 = vpop.xlane.xlu1 %2378 }
 0x405   :  { %v2493_v0 = vmul.f32 %v3601_v35, %v4670_v4  ;;  %3610 = vrcp.f32 %v2379_v43  ;;  %v2377_v22 = vpop.xlane.xlu0 %2376 }
 0x406   :  { %2600 = vst.msk [vmem:[%s5154_s7 + $0xb8] sm:$0xff] %vm2576_vm7, %v2495_v50  ;;  %3612 = vrcp.f32 %v2377_v22 }
 0x407   :  { %v3603_v56 = vpop.eup %3602  ;;  %2599 = vst.msk [vmem:[%s5154_s7 + $0xb0] sm:$0xff] %vm2576_vm7, %v2493_v0 }
 0x408   :  { %v3605_v26 = vpop.eup %3604  ;;  %v2499_v37 = vmul.f32 %v3603_v56, %v4676_v58  ;;  %v2383_v31 = vpop.xlane.xlu1 %2382 }
 0x409   :  { %v2497_v4 = vmul.f32 %v3605_v26, %v4678_v8  ;;  %3614 = vrcp.f32 %v2383_v31  ;;  %v2381_v17 = vpop.xlane.xlu0 %2380 }
 0x40a   :  { %2602 = vst.msk [vmem:[%s5154_s7 + $0xc8] sm:$0xff] %vm2576_vm7, %v2499_v37  ;;  %3616 = vrcp.f32 %v2381_v17 }
 0x40b   :  { %v3607_v44 = vpop.eup %3606  ;;  %2601 = vst.msk [vmem:[%s5154_s7 + $0xc0] sm:$0xff] %vm2576_vm7, %v2497_v4 }
 0x40c   :  { %v3609_v34 = vpop.eup %3608  ;;  %v2503_v58 = vmul.f32 %v3607_v44, %v4684_v48  ;;  %v2387_v63 = vpop.xlane.xlu1 %2386 }
 0x40d   :  { %v2501_v8 = vmul.f32 %v3609_v34, %v4686_v12  ;;  %3618 = vrcp.f32 %v2387_v63  ;;  %v2385_v36 = vpop.xlane.xlu0 %2384 }
 0x40e   :  { %2604 = vst.msk [vmem:[%s5154_s7 + $0xd8] sm:$0xff] %vm2576_vm7, %v2503_v58  ;;  %3620 = vrcp.f32 %v2385_v36 }
 0x40f   :  { %v3611_v40 = vpop.eup %3610  ;;  %2603 = vst.msk [vmem:[%s5154_s7 + $0xd0] sm:$0xff] %vm2576_vm7, %v2501_v8 }
 0x410   :  { %v3613_v42 = vpop.eup %3612  ;;  %v2507_v48 = vmul.f32 %v3611_v40, %v4692_v54  ;;  %v2391_v3 = vpop.xlane.xlu1 %2390 }
 0x411   :  { %v2505_v12 = vmul.f32 %v3613_v42, %v4694_v15  ;;  %3622 = vrcp.f32 %v2391_v3  ;;  %v2389_v46 = vpop.xlane.xlu0 %2388 }
 0x412   :  { %2606 = vst.msk [vmem:[%s5154_s7 + $0xe8] sm:$0xff] %vm2576_vm7, %v2507_v48  ;;  %3624 = vrcp.f32 %v2389_v46 }
 0x413   :  { %v3615_v18 = vpop.eup %3614  ;;  %2605 = vst.msk [vmem:[%s5154_s7 + $0xe0] sm:$0xff] %vm2576_vm7, %v2505_v12 }
 0x414   :  { %v3617_v11 = vpop.eup %3616  ;;  %v2511_v54 = vmul.f32 %v3615_v18, %v4700_v41  ;;  %v2395_v23 = vpop.xlane.xlu1 %2394  ;;  %v5217_v18 = vld [vmem:[#allocation2_spill] sm:$0xff] }
 0x415   :  { %v2509_v15 = vmul.f32 %v3617_v11, %v4702_v19  ;;  %3626 = vrcp.f32 %v2395_v23  ;;  %v2393_v5 = vpop.xlane.xlu0 %2392 }
 0x416   :  { %2608 = vst.msk [vmem:[%s5154_s7 + $0xf8] sm:$0xff] %vm2576_vm7, %v2511_v54  ;;  %3628 = vrcp.f32 %v2393_v5  ;;  %v5218_v54 = vld [vmem:[#allocation3_spill] sm:$0xff] }
 0x417   :  { %v3619_v38 = vpop.eup %3618  ;;  %2607 = vst.msk [vmem:[%s5154_s7 + $0xf0] sm:$0xff] %vm2576_vm7, %v2509_v15 }
 0x418   :  { %v3621_v27 = vpop.eup %3620  ;;  %v2515_v41 = vmul.f32 %v3619_v38, %v4708_v62  ;;  %v2399_v51 = vpop.xlane.xlu1 %2398  ;;  %v5219_v38 = vld [vmem:[#allocation4_spill] sm:$0xff] }
 0x419   :  { %v2513_v19 = vmul.f32 %v3621_v27, %v4710_v24  ;;  %3630 = vrcp.f32 %v2399_v51  ;;  %v2397_v20 = vpop.xlane.xlu0 %2396  ;;  %v5220_v51 = vld [vmem:[#allocation5_spill] sm:$0xff] }
 0x41a   :  { %2610 = vst.msk [vmem:[%s5154_s7 + $0x108] sm:$0xff] %vm2576_vm7, %v2515_v41  ;;  %3632 = vrcp.f32 %v2397_v20 }
 0x41b   :  { %v3623_v52 = vpop.eup %3622  ;;  %2609 = vst.msk [vmem:[%s5154_s7 + $0x100] sm:$0xff] %vm2576_vm7, %v2513_v19 }
 0x41c   :  { %v3625_v57 = vpop.eup %3624  ;;  %v2519_v62 = vmul.f32 %v3623_v52, %v4716_v2  ;;  %v2403_v7 = vpop.xlane.xlu1 %2402 }
 0x41d   :  { %v2517_v24 = vmul.f32 %v3625_v57, %v4718_v28  ;;  %3634 = vrcp.f32 %v2403_v7  ;;  %v2401_v59 = vpop.xlane.xlu0 %2400 }
 0x41e   :  { %2612 = vst.msk [vmem:[%s5154_s7 + $0x118] sm:$0xff] %vm2576_vm7, %v2519_v62  ;;  %3636 = vrcp.f32 %v2401_v59  ;;  %v5221_v62 = vld [vmem:[#allocation6_spill] sm:$0xff] }
 0x41f   :  { %v3627_v60 = vpop.eup %3626  ;;  %2611 = vst.msk [vmem:[%s5154_s7 + $0x110] sm:$0xff] %vm2576_vm7, %v2517_v24 }
 0x420   :  { %v3629_v30 = vpop.eup %3628  ;;  %v2523_v2 = vmul.f32 %v3627_v60, %v4724_v6  ;;  %v2407_v9 = vpop.xlane.xlu1 %2406 }
 0x421   :  { %v2521_v28 = vmul.f32 %v3629_v30, %v4726_v33  ;;  %3638 = vrcp.f32 %v2407_v9  ;;  %v2405_v35 = vpop.xlane.xlu0 %2404 }
 0x422   :  { %2614 = vst.msk [vmem:[%s5154_s7 + $0x128] sm:$0xff] %vm2576_vm7, %v2523_v2  ;;  %3640 = vrcp.f32 %v2405_v35 }
 0x423   :  { %v3631_v50 = vpop.eup %3630  ;;  %2613 = vst.msk [vmem:[%s5154_s7 + $0x120] sm:$0xff] %vm2576_vm7, %v2521_v28 }
 0x424   :  { %v3633_v43 = vpop.eup %3632  ;;  %v2527_v6 = vmul.f32 %v3631_v50, %v4732_v10  ;;  %v2411_v0 = vpop.xlane.xlu1 %2410 }
 0x425   :  { %v2525_v33 = vmul.f32 %v3633_v43, %v4734_v32  ;;  %3642 = vrcp.f32 %v2411_v0  ;;  %v2409_v22 = vpop.xlane.xlu0 %2408 }
 0x426   :  { %2616 = vst.msk [vmem:[%s5154_s7 + $0x138] sm:$0xff] %vm2576_vm7, %v2527_v6  ;;  %3644 = vrcp.f32 %v2409_v22 }
 0x427   :  { %v3635_v56 = vpop.eup %3634  ;;  %2615 = vst.msk [vmem:[%s5154_s7 + $0x130] sm:$0xff] %vm2576_vm7, %v2525_v33 }
 0x428   :  { %v3637_v26 = vpop.eup %3636  ;;  %v2531_v10 = vmul.f32 %v3635_v56, %v4740_v14  ;;  %v2415_v37 = vpop.xlane.xlu1 %2414  ;;  %v5222_v56 = vld [vmem:[#allocation7_spill] sm:$0xff] }
 0x429   :  { %v2529_v32 = vmul.f32 %v3637_v26, %v4742_v45  ;;  %3646 = vrcp.f32 %v2415_v37  ;;  %v2413_v31 = vpop.xlane.xlu0 %2412  ;;  %v5223_v37 = vld [vmem:[#allocation8_spill] sm:$0xff] }
 0x42a   :  { %2618 = vst.msk [vmem:[%s5154_s7 + $0x148] sm:$0xff] %vm2576_vm7, %v2531_v10  ;;  %3648 = vrcp.f32 %v2413_v31  ;;  %v5224_v31 = vld [vmem:[#allocation9_spill] sm:$0xff] }
 0x42b   :  { %v3639_v4 = vpop.eup %3638  ;;  %2617 = vst.msk [vmem:[%s5154_s7 + $0x140] sm:$0xff] %vm2576_vm7, %v2529_v32 }
 0x42c   :  { %v3641_v17 = vpop.eup %3640  ;;  %v2535_v14 = vmul.f32 %v3639_v4, %v4748_v53  ;;  %v2419_v44 = vpop.xlane.xlu1 %2418 }
 0x42d   :  { %v2533_v45 = vmul.f32 %v3641_v17, %v4750_v16  ;;  %3650 = vrcp.f32 %v2419_v44  ;;  %v2417_v34 = vpop.xlane.xlu0 %2416 }
 0x42e   :  { %2620 = vst.msk [vmem:[%s5154_s7 + $0x158] sm:$0xff] %vm2576_vm7, %v2535_v14  ;;  %3652 = vrcp.f32 %v2417_v34  ;;  %v5225_v14 = vld [vmem:[#allocation10_spill] sm:$0xff] }
 0x42f   :  { %v3643_v58 = vpop.eup %3642  ;;  %2619 = vst.msk [vmem:[%s5154_s7 + $0x150] sm:$0xff] %vm2576_vm7, %v2533_v45  ;;  %v5226_v45 = vld [vmem:[#allocation11_spill] sm:$0xff] }
 0x430   :  { %v3645_v63 = vpop.eup %3644  ;;  %v2539_v53 = vmul.f32 %v3643_v58, %v4756_v1  ;;  %v2423_v8 = vpop.xlane.xlu1 %2422 }
 0x431   :  { %v2537_v16 = vmul.f32 %v3645_v63, %v4758_v29  ;;  %3654 = vrcp.f32 %v2423_v8  ;;  %v2421_v36 = vpop.xlane.xlu0 %2420 }
 0x432   :  { %2622 = vst.msk [vmem:[%s5154_s7 + $0x168] sm:$0xff] %vm2576_vm7, %v2539_v53  ;;  %3656 = vrcp.f32 %v2421_v36 }
 0x433   :  { %v3647_v40 = vpop.eup %3646  ;;  %2621 = vst.msk [vmem:[%s5154_s7 + $0x160] sm:$0xff] %vm2576_vm7, %v2537_v16 }
 0x434   :  { %v3649_v42 = vpop.eup %3648  ;;  %v2543_v1 = vmul.f32 %v3647_v40, %v4764_v13  ;;  %v2427_v48 = vpop.xlane.xlu1 %2426 }
 0x435   :  { %v2541_v29 = vmul.f32 %v3649_v42, %v4766_v47  ;;  %3658 = vrcp.f32 %v2427_v48  ;;  %v2425_v3 = vpop.xlane.xlu0 %2424 }
 0x436   :  { %2624 = vst.msk [vmem:[%s5154_s7 + $0x178] sm:$0xff] %vm2576_vm7, %v2543_v1  ;;  %3660 = vrcp.f32 %v2425_v3 }
 0x437   :  { %v3651_v12 = vpop.eup %3650  ;;  %2623 = vst.msk [vmem:[%s5154_s7 + $0x170] sm:$0xff] %vm2576_vm7, %v2541_v29 }
 0x438   :  { %v3653_v46 = vpop.eup %3652  ;;  %v2547_v13 = vmul.f32 %v3651_v12, %v5217_v18  ;;  %v2431_v11 = vpop.xlane.xlu1 %2430 }
 0x439   :  { %v2545_v47 = vmul.f32 %v3653_v46, %v5218_v54  ;;  %3662 = vrcp.f32 %v2431_v11  ;;  %v2429_v23 = vpop.xlane.xlu0 %2428 }
 0x43a   :  { %2626 = vst.msk [vmem:[%s5154_s7 + $0x188] sm:$0xff] %vm2576_vm7, %v2547_v13  ;;  %3664 = vrcp.f32 %v2429_v23 }
 0x43b   :  { %v3655_v15 = vpop.eup %3654  ;;  %2625 = vst.msk [vmem:[%s5154_s7 + $0x180] sm:$0xff] %vm2576_vm7, %v2545_v47 }
 0x43c   :  { %v3657_v5 = vpop.eup %3656  ;;  %v2551_v27 = vmul.f32 %v3655_v15, %v5219_v38  ;;  %v2435_v41 = vpop.xlane.xlu1 %2434 }
 0x43d   :  { %v2549_v19 = vmul.f32 %v3657_v5, %v5220_v51  ;;  %3666 = vrcp.f32 %v2435_v41  ;;  %v2433_v20 = vpop.xlane.xlu0 %2432 }
 0x43e   :  { %2628 = vst.msk [vmem:[%s5154_s7 + $0x198] sm:$0xff] %vm2576_vm7, %v2551_v27  ;;  %3668 = vrcp.f32 %v2433_v20 }
 0x43f   :  { %v3659_v52 = vpop.eup %3658  ;;  %2627 = vst.msk [vmem:[%s5154_s7 + $0x190] sm:$0xff] %vm2576_vm7, %v2549_v19 }
 0x440   :  { %v3661_v57 = vpop.eup %3660  ;;  %v2555_v7 = vmul.f32 %v3659_v52, %v5221_v62  ;;  %v2439_v24 = vpop.xlane.xlu1 %2438 }
 0x441   :  { %v2553_v59 = vmul.f32 %v3661_v57, %v4790_v49  ;;  %3670 = vrcp.f32 %v2439_v24  ;;  %v2437_v60 = vpop.xlane.xlu0 %2436 }
 0x442   :  { %2630 = vst.msk [vmem:[%s5154_s7 + $0x1a8] sm:$0xff] %vm2576_vm7, %v2555_v7  ;;  %3672 = vrcp.f32 %v2437_v60 }
 0x443   :  { %v3663_v30 = vpop.eup %3662  ;;  %2629 = vst.msk [vmem:[%s5154_s7 + $0x1a0] sm:$0xff] %vm2576_vm7, %v2553_v59 }
 0x444   :  { %v3665_v2 = vpop.eup %3664  ;;  %v2559_v9 = vmul.f32 %v3663_v30, %v4796_v21  ;;  %v2443_v28 = vpop.xlane.xlu1 %2442 }
 0x445   :  { %v2557_v49 = vmul.f32 %v3665_v2, %v4798_v61  ;;  %3674 = vrcp.f32 %v2443_v28  ;;  %v2441_v35 = vpop.xlane.xlu0 %2440 }
 0x446   :  { %2632 = vst.msk [vmem:[%s5154_s7 + $0x1b8] sm:$0xff] %vm2576_vm7, %v2559_v9  ;;  %3676 = vrcp.f32 %v2441_v35 }
 0x447   :  { %v3667_v50 = vpop.eup %3666  ;;  %2631 = vst.msk [vmem:[%s5154_s7 + $0x1b0] sm:$0xff] %vm2576_vm7, %v2557_v49 }
 0x448   :  { %v3669_v43 = vpop.eup %3668  ;;  %v2563_v21 = vmul.f32 %v3667_v50, %v4803_v39  ;;  %v2447_v6 = vpop.xlane.xlu1 %2446 }
 0x449   :  { %v2561_v61 = vmul.f32 %v3669_v43, %v4805_v25  ;;  %3678 = vrcp.f32 %v2447_v6  ;;  %v2445_v0 = vpop.xlane.xlu0 %2444 }
 0x44a   :  { %2634 = vst.msk [vmem:[%s5154_s7 + $0x1c8] sm:$0xff] %vm2576_vm7, %v2563_v21  ;;  %3680 = vrcp.f32 %v2445_v0 }
 0x44b   :  { %v3671_v33 = vpop.eup %3670  ;;  %2633 = vst.msk [vmem:[%s5154_s7 + $0x1c0] sm:$0xff] %vm2576_vm7, %v2561_v61 }
 0x44c   :  { %v3673_v22 = vpop.eup %3672  ;;  %v2567_v39 = vmul.f32 %v3671_v33, %v4809_v55 }
 0x44d   :  { %v2565_v26 = vmul.f32 %v3673_v22, %v5222_v56 }
 0x44e   :  { %2636 = vst.msk [vmem:[%s5154_s7 + $0x1d8] sm:$0xff] %vm2576_vm7, %v2567_v39 }
 0x44f   :  { %v3675_v25 = vpop.eup %3674  ;;  %2635 = vst.msk [vmem:[%s5154_s7 + $0x1d0] sm:$0xff] %vm2576_vm7, %v2565_v26 }
 0x450   :  { %v3677_v10 = vpop.eup %3676  ;;  %v2571_v32 = vmul.f32 %v3675_v25, %v5223_v37 }
 0x451   :  { %v2569_v4 = vmul.f32 %v3677_v10, %v5224_v31 }
 0x452   :  { %2638 = vst.msk [vmem:[%s5154_s7 + $0x1e8] sm:$0xff] %vm2576_vm7, %v2571_v32 }
 0x453   :  { %v3679_v55 = vpop.eup %3678  ;;  %2637 = vst.msk [vmem:[%s5154_s7 + $0x1e0] sm:$0xff] %vm2576_vm7, %v2569_v4 }
 0x454   :  { %v3681_v17 = vpop.eup %3680  ;;  %v2575_v44 = vmul.f32 %v3679_v55, %v5225_v14 }
 0x455   :  { %v2573_v34 = vmul.f32 %v3681_v17, %v5226_v45 }
 0x456   :  { %2640 = vst.msk [vmem:[%s5154_s7 + $0x1f8] sm:$0xff] %vm2576_vm7, %v2575_v44 }
 0x457   :  { %2639 = vst.msk [vmem:[%s5154_s7 + $0x1f0] sm:$0xff] %vm2576_vm7, %v2573_v34 }

</bundles_post_ra>
